<compile_context>
chip_gen: v6e
topology: v6e:2x2x1
jax: 0.10.0
libtpu: 0.0.40
codegen_flags: <defaults>
</compile_context>

<pallas_src>
import functools
import math

import numpy as np
import jax
import jax.numpy as jnp
from jax import lax
from jax.experimental import pallas as pl
from jax.experimental.pallas import tpu as pltpu

_CONV_K = 11          # merged inception kernel size (num_kernels=6 -> 11x11)
_LANE = 128
_SUBLANE = 8


def _round_up(v, m):
    return ((v + m - 1) // m) * m


def _pad_k(k):
    """Pad a contraction dim to an (8,128)-friendly size."""
    kp = _round_up(k, _SUBLANE)
    if kp > 128:
        kp = _round_up(kp, 128)
    if kp > 1024:
        kp = _round_up(kp, 512)
    return kp


def _pick_tm(m):
    """M tile: minimal padding, and >=2 M-blocks when possible (v7x 2 TCs)."""
    if m <= 8:
        return 8
    if m <= 256:
        return _round_up((m + 1) // 2, _SUBLANE)
    return 128


# ---------------------------------------------------------------------------
# Fused activations applied in the matmul finalize (VPU/EUP ride under MXU)
# ---------------------------------------------------------------------------
def _apply_act(y, activation, col0, split_col):
    if activation is None:
        return y
    if activation == "relu":
        return jnp.maximum(y, 0.0)
    if activation == "sigmoid":
        # EUP reciprocal instead of an f32 VPU divide sequence (v5e-friendly).
        return pl.reciprocal(1.0 + jnp.exp(-y), approx=True)
    if activation == "softplus_tail":
        # softplus only on columns >= split_col (the 'var' half of loc|var).
        sp = jnp.maximum(y, 0.0) + jnp.log(1.0 + jnp.exp(-jnp.abs(y)))
        col = col0 + lax.broadcasted_iota(jnp.int32, y.shape, 1)
        return jnp.where(col >= split_col, sp, y)
    raise ValueError(f"unknown activation {activation}")


# ---------------------------------------------------------------------------
# Pallas kernel 1: tiled matmul + bias (+ fused activation)
#   K-grid==1 fast path: no VMEM accumulator round-trip.
# ---------------------------------------------------------------------------
def _linear_kernel_k1(x_ref, w_ref, b_ref, o_ref, *, activation, split_col, tn):
    y = jnp.dot(x_ref[...], w_ref[...],
                preferred_element_type=jnp.float32) + b_ref[...]
    col0 = pl.program_id(1) * tn
    o_ref[...] = _apply_act(y, activation, col0, split_col).astype(o_ref.dtype)


def _linear_kernel_kt(x_ref, w_ref, b_ref, o_ref, acc_ref, *,
                      activation, split_col, tn):
    @pl.when(pl.program_id(2) == 0)
    def _init():
        acc_ref[...] = jnp.zeros_like(acc_ref)

    acc_ref[...] += jnp.dot(x_ref[...], w_ref[...],
                            preferred_element_type=jnp.float32)

    @pl.when(pl.program_id(2) == pl.num_programs(2) - 1)
    def _finalize():
        y = acc_ref[...] + b_ref[...]
        col0 = pl.program_id(1) * tn
        o_ref[...] = _apply_act(y, activation, col0, split_col).astype(o_ref.dtype)


def linear_pallas(x, w_pad, b_pad, n_out, activation=None, split_col=0):
    """y = act(x @ W + b) with pre-padded bf16 weights; lane-dense output."""
    lead = x.shape[:-1]
    K = x.shape[-1]
    M = int(np.prod(lead)) if lead else 1
    Kp, Np = int(w_pad.shape[0]), int(w_pad.shape[1])

    x2 = x.reshape(M, K).astype(jnp.bfloat16)
    if Kp != K:
        x2 = jnp.pad(x2, ((0, 0), (0, Kp - K)))

    TM = _pick_tm(M)
    Mp = _round_up(M, TM)
    if Mp != M:
        x2 = jnp.pad(x2, ((0, Mp - M), (0, 0)))
    TN = 256 if Np % 256 == 0 else 128
    nm, nn = Mp // TM, Np // TN

    trans = Mp * Np if activation in ("sigmoid", "softplus_tail") else 0
    cost = pl.CostEstimate(
        flops=2 * Mp * Kp * Np,
        transcendentals=trans,
        bytes_accessed=2 * (Mp * Kp + Kp * Np) + 4 * (Np + Mp * Np))

    if Kp <= 1024:
        # Single K step (every call in this model): direct dot+bias+act write.
        out = pl.pallas_call(
            functools.partial(_linear_kernel_k1, activation=activation,
                              split_col=split_col, tn=TN),
            out_shape=jax.ShapeDtypeStruct((Mp, Np), jnp.float32),
            grid_spec=pltpu.PrefetchScalarGridSpec(
                num_scalar_prefetch=0,
                grid=(nm, nn),
                in_specs=[
                    pl.BlockSpec((TM, Kp), lambda i, j: (i, 0)),
                    pl.BlockSpec((Kp, TN), lambda i, j: (0, j)),
                    pl.BlockSpec((1, TN), lambda i, j: (0, j)),
                ],
                out_specs=pl.BlockSpec((TM, TN), lambda i, j: (i, j)),
            ),
            compiler_params=pltpu.CompilerParams(
                dimension_semantics=("parallel", "parallel")),
            cost_estimate=cost,
        )(x2, w_pad, b_pad)
    else:
        TK = 512
        nk = Kp // TK
        out = pl.pallas_call(
            functools.partial(_linear_kernel_kt, activation=activation,
                              split_col=split_col, tn=TN),
            out_shape=jax.ShapeDtypeStruct((Mp, Np), jnp.float32),
            grid_spec=pltpu.PrefetchScalarGridSpec(
                num_scalar_prefetch=0,
                grid=(nm, nn, nk),
                in_specs=[
                    pl.BlockSpec((TM, TK), lambda i, j, k: (i, k)),
                    pl.BlockSpec((TK, TN), lambda i, j, k: (k, j)),
                    pl.BlockSpec((1, TN), lambda i, j, k: (0, j)),
                ],
                out_specs=pl.BlockSpec((TM, TN), lambda i, j, k: (i, j)),
                scratch_shapes=[pltpu.VMEM((TM, TN), jnp.float32)],
            ),
            compiler_params=pltpu.CompilerParams(
                dimension_semantics=("parallel", "parallel", "arbitrary")),
            cost_estimate=cost,
        )(x2, w_pad, b_pad)

    out = out[:M, :n_out]
    return out.reshape(lead + (n_out,))


# ---------------------------------------------------------------------------
# Pallas kernel 2: fused critic MLP  sigmoid(relu(x@W1+b1)@W2+b2)
# ---------------------------------------------------------------------------
def _critic_kernel(x_ref, w1_ref, b1_ref, w2_ref, b2_ref, o_ref):
    h = jnp.dot(x_ref[...], w1_ref[...],
                preferred_element_type=jnp.float32) + b1_ref[...]
    h = jnp.maximum(h, 0.0)
    y = jnp.dot(h.astype(jnp.bfloat16), w2_ref[...],
                preferred_element_type=jnp.float32) + b2_ref[...]
    o_ref[...] = pl.reciprocal(1.0 + jnp.exp(-y), approx=True).astype(o_ref.dtype)


def critic_pallas(x_cat, w1, b1, w2, b2):
    lead = x_cat.shape[:-1]
    K = x_cat.shape[-1]
    M = int(np.prod(lead)) if lead else 1
    K1p, N1p = int(w1.shape[0]), int(w1.shape[1])
    N2p = int(w2.shape[1])

    x2 = x_cat.reshape(M, K).astype(jnp.bfloat16)
    if K1p != K:
        x2 = jnp.pad(x2, ((0, 0), (0, K1p - K)))
    # TM capped at 256 so the live f32 hidden tile stays vreg/VMEM friendly.
    TM = min(_pick_tm(M), 256)
    Mp = _round_up(M, TM)
    if Mp != M:
        x2 = jnp.pad(x2, ((0, Mp - M), (0, 0)))

    cost = pl.CostEstimate(
        flops=2 * Mp * (K1p * N1p + N1p * N2p),
        transcendentals=Mp * N2p,
        bytes_accessed=2 * (Mp * K1p + K1p * N1p + N1p * N2p) + 4 * Mp * N2p)

    out = pl.pallas_call(
        _critic_kernel,
        out_shape=jax.ShapeDtypeStruct((Mp, N2p), jnp.float32),
        grid_spec=pltpu.PrefetchScalarGridSpec(
            num_scalar_prefetch=0,
            grid=(Mp // TM,),
            in_specs=[
                pl.BlockSpec((TM, K1p), lambda i: (i, 0)),
                pl.BlockSpec((K1p, N1p), lambda i: (0, 0)),
                pl.BlockSpec((1, N1p), lambda i: (0, 0)),
                pl.BlockSpec((N1p, N2p), lambda i: (0, 0)),
                pl.BlockSpec((1, N2p), lambda i: (0, 0)),
            ],
            out_specs=pl.BlockSpec((TM, N2p), lambda i: (i, 0)),
        ),
        compiler_params=pltpu.CompilerParams(dimension_semantics=("parallel",)),
        cost_estimate=cost,
    )(x2, w1, b1, w2, b2)

    out = out[:M, :1]
    return out.reshape(lead + (1,))


# ---------------------------------------------------------------------------
# Helper math (plain JAX "glue": FFTs, reductions)
# ---------------------------------------------------------------------------
_NEXT_FAST_LEN = {}


def next_fast_len(size):
    try:
        return _NEXT_FAST_LEN[size]
    except KeyError:
        pass
    assert isinstance(size, int) and size > 0
    next_size = size
    while True:
        remaining = next_size
        for n in (2, 3, 5):
            while remaining % n == 0:
                remaining //= n
        if remaining == 1:
            _NEXT_FAST_LEN[size] = next_size
            return next_size
        next_size += 1


# TODO(synk): rfft/irfft have no Pallas TPU primitive; done with jnp.fft (XLA).
def autocorrelation(x):
    N = x.shape[-1]
    M = next_fast_len(N)
    M2 = 2 * M
    centered = x - x.mean(axis=-1, keepdims=True)
    fv = jnp.fft.rfft(centered, n=M2, axis=-1)
    gram = jnp.real(fv) ** 2 + jnp.imag(fv) ** 2
    ac = jnp.fft.irfft(gram, n=M2, axis=-1)[..., :N]
    ac = ac / jnp.arange(N, 0, -1, dtype=x.dtype)
    # Matches torch: no epsilon guard (near-constant rows -> Inf, same as ref).
    ac = ac / ac[..., :1]
    return ac


def period_sim(x, y):
    T = x.shape[1]
    x2 = x.reshape(-1, T)
    y2 = y.reshape(-1, T)
    x_ac = autocorrelation(x2)[:, 1:]
    y_ac = autocorrelation(y2)[:, 1:]
    distance = jnp.mean(jnp.mean((x_ac - y_ac) ** 2, axis=1))
    return -distance


def compute_KL(z, mean, var):
    log_p_z = jnp.mean(-0.5 * z ** 2, axis=1)
    log_q_z = jnp.mean(-0.5 * (jnp.log(var) + (z - mean) ** 2 / var ** 2), axis=1)
    kl = -(log_p_z - log_q_z)
    return kl.mean()


def compute_MLBO(params, x, z_q, key):
    B = z_q.shape[0]
    idx = jax.random.permutation(key, B)
    z_shuf = z_q[idx]
    # Batch both critic evaluations (z_q and z_shuffle) into ONE fused call.
    both = jnp.concatenate([jnp.concatenate([x, z_q], axis=-1),
                            jnp.concatenate([x, z_shuf], axis=-1)], axis=0)
    c = critic_pallas(both, params["critic1_w"], params["critic1_b"],
                      params["critic2_w"], params["critic2_b"])        # (2B,T,1)
    c_q, c_s = c[:B], c[B:]
    point = 1.0 / jnp.exp(c_s).squeeze(-1).mean()
    point = jax.lax.stop_gradient(point)
    mlbo = c_q - point * jnp.exp(c_s)
    return mlbo.mean()


# ---------------------------------------------------------------------------
# Period selection (host; shapes downstream are data-dependent)
# ---------------------------------------------------------------------------
def select_periods(x, top_k):
    # TODO(synk): the top-k periods induce data-dependent reshape shapes, so
    # this (tiny) frequency ranking is resolved on host ONCE; the rest of the
    # forward is a single jit with static period shapes.
    T = x.shape[1]
    xf = jnp.fft.rfft(x, axis=1)
    freq = jnp.abs(xf).mean(0).mean(-1)
    freq = freq.at[0].set(0.0)
    freq_np = np.asarray(jax.device_get(freq))
    top_list = np.argsort(-freq_np, kind="stable")[:top_k]
    periods = tuple(int(T // int(i)) for i in top_list)
    top_idx = tuple(int(i) for i in top_list)
    return periods, top_idx


# ---------------------------------------------------------------------------
# TimesBlock (pred_len = 0 inside SNet).  The 6 inception convs average into
# one merged 11x11 "same" conv; run in bf16 via lax.conv_general_dilated so no
# im2col patch matrix is ever materialized in HBM.
# ---------------------------------------------------------------------------
def times_block(params, x, periods, top_idx):
    B, T, N = x.shape
    xf = jnp.fft.rfft(x, axis=1)
    period_weight = jnp.take(jnp.abs(xf).mean(-1),
                             jnp.asarray(top_idx, dtype=jnp.int32), axis=1)  # (B,k)

    dn = ("NHWC", "HWIO", "NHWC")
    res = []
    for p in periods:
        if T % p != 0:
            length = (T // p + 1) * p
            out = jnp.concatenate(
                [x, jnp.zeros((B, length - T, N), x.dtype)], axis=1)
        else:
            length = T
            out = x
        H = length // p
        g = out.reshape(B, H, p, N).astype(jnp.bfloat16)

        h1 = lax.conv_general_dilated(
            g, params["conv1_w"], window_strides=(1, 1), padding="SAME",
            dimension_numbers=dn, preferred_element_type=jnp.float32)
        h1 = jax.nn.gelu(h1 + params["conv1_b"], approximate=False)

        h2 = lax.conv_general_dilated(
            h1.astype(jnp.bfloat16), params["conv2_w"], window_strides=(1, 1),
            padding="SAME", dimension_numbers=dn,
            preferred_element_type=jnp.float32) + params["conv2_b"]

        res.append(h2.reshape(B, H * p, N)[:, :T, :])

    res = jnp.stack(res, axis=-1)                                   # (B,T,N,k)
    pw = jax.nn.softmax(period_weight, axis=1)[:, None, None, :]
    return jnp.sum(res * pw, axis=-1).astype(x.dtype) + x


# ---------------------------------------------------------------------------
# SNet forward (jitted body; periods resolved eagerly beforehand)
# ---------------------------------------------------------------------------
@functools.partial(jax.jit, static_argnames=(
    "mean_inference", "periods", "top_idx", "pred_len", "out_dim", "inner_s"))
def _snet_forward_impl(params, x_his, key, *, mean_inference, periods, top_idx,
                       pred_len, out_dim, inner_s):
    seq_len = x_his.shape[1]
    in_dim = x_his.shape[2]

    x_his = times_block(params, x_his, periods, top_idx)

    # VarUnit_s: loc + var projections fused into one matmul; softplus on the
    # var columns fused into the kernel finalize via a column mask.
    mv = linear_pallas(x_his, params["locvar_w"], params["locvar_b"],
                       2 * inner_s, activation="softplus_tail",
                       split_col=inner_s)
    mean_qz = mv[..., :inner_s]
    var_qz = mv[..., inner_s:]

    k_eps, k_perm = jax.random.split(key)
    eps = jax.random.normal(k_eps, mean_qz.shape, dtype=mean_qz.dtype)
    qz = mean_qz + var_qz * eps                                     # rsample (scale = var)

    # RecUnit_s
    xs_rec = linear_pallas(qz, params["rec_w"], params["rec_b"], in_dim)

    elbo_s = period_sim(xs_rec, x_his) - compute_KL(qz, mean_qz, var_qz)
    mlbo_s = compute_MLBO(params, x_his, qz, k_perm)

    # NeuralFourierLayer (mask=False): rfft -> keep freq_num -> irfft(n=out_len)
    freq_num = seq_len // 2 + 1
    out_len = seq_len + pred_len
    z_src = mean_qz if mean_inference else qz
    z_fft = jnp.fft.rfft(z_src, axis=1)[:, :freq_num]
    z_time = jnp.fft.irfft(z_fft, n=out_len, axis=1)
    xs_pred = linear_pallas(z_time[:, -pred_len:],
                            params["pred_w"], params["pred_b"], out_dim)

    return xs_pred, xs_rec, elbo_s, mlbo_s


def snet_forward(params, x_his, mean_inference, key, pred_len, out_dim, inner_s,
                 top_k=5):
    periods, top_idx = select_periods(x_his, top_k)
    return _snet_forward_impl(params, x_his, key,
                              mean_inference=mean_inference, periods=periods,
                              top_idx=top_idx, pred_len=pred_len,
                              out_dim=out_dim, inner_s=inner_s)


# ---------------------------------------------------------------------------
# Deterministic parameter init (shapes from the module __init__) + TPU prep
# ---------------------------------------------------------------------------
def _init_inception_merged(key, cin, cout, num_kernels=6):
    # 6 same-padded convs (k = 1,3,...,11), averaged -> one merged 11x11 conv.
    kmax = 2 * (num_kernels - 1) + 1
    merged = jnp.zeros((kmax, kmax, cin, cout), jnp.float32)
    wkeys = jax.random.split(key, num_kernels)
    for i in range(num_kernels):
        ks = 2 * i + 1
        std = math.sqrt(2.0 / (cout * ks * ks))                    # kaiming_normal_, fan_out, relu
        wi = std * jax.random.normal(wkeys[i], (ks, ks, cin, cout), jnp.float32)
        off = (kmax - ks) // 2
        merged = merged.at[off:off + ks, off:off + ks].add(wi)
    merged = merged / num_kernels
    bias = jnp.zeros((cout,), jnp.float32)                         # torch: bias init = 0
    return merged, bias


def _init_linear(key, din, dout):
    k1, k2 = jax.random.split(key)
    bound = 1.0 / math.sqrt(din)
    w = jax.random.uniform(k1, (din, dout), jnp.float32, -bound, bound)
    b = jax.random.uniform(k2, (dout,), jnp.float32, -bound, bound)
    return w, b


def _prep_linear(w, b, kp=None, np_out=None):
    """Pad to lane/sublane-aligned shapes once, pre-cast weights to bf16."""
    K, N = int(w.shape[0]), int(w.shape[1])
    if kp is None:
        kp = _pad_k(K)
    if np_out is None:
        np_out = _round_up(N, _LANE)
    w_p = jnp.zeros((kp, np_out), jnp.bfloat16).at[:K, :N].set(w.astype(jnp.bfloat16))
    b_p = jnp.zeros((1, np_out), jnp.float32).at[0, :N].set(b.astype(jnp.float32))
    return w_p, b_p


def init_params(key, in_dim, out_dim, inner_s):
    ks = jax.random.split(key, 8)
    cat_dim = inner_s + in_dim

    conv1_w, conv1_b = _init_inception_merged(ks[0], in_dim, in_dim)
    conv2_w, conv2_b = _init_inception_merged(ks[1], in_dim, in_dim)
    loc_w, loc_b = _init_linear(ks[2], in_dim, inner_s)
    var_w, var_b = _init_linear(ks[3], in_dim, inner_s)
    rec_w, rec_b = _init_linear(ks[4], inner_s, in_dim)
    cr1_w, cr1_b = _init_linear(ks[5], cat_dim, cat_dim // 4)
    cr2_w, cr2_b = _init_linear(ks[6], cat_dim // 4, 1)
    pred_w, pred_b = _init_linear(ks[7], inner_s, out_dim)

    p = {}
    # merged 11x11 conv weights in HWIO, pre-cast to bf16 for the XLA conv.
    p["conv1_w"], p["conv1_b"] = conv1_w.astype(jnp.bfloat16), conv1_b
    p["conv2_w"], p["conv2_b"] = conv2_w.astype(jnp.bfloat16), conv2_b
    # fused loc|var projection
    p["locvar_w"], p["locvar_b"] = _prep_linear(
        jnp.concatenate([loc_w, var_w], axis=1),
        jnp.concatenate([loc_b, var_b], axis=0))
    p["rec_w"], p["rec_b"] = _prep_linear(rec_w, rec_b)
    p["pred_w"], p["pred_b"] = _prep_linear(pred_w, pred_b)
    # fused critic: layer-2 contraction dim must match layer-1 padded width
    p["critic1_w"], p["critic1_b"] = _prep_linear(cr1_w, cr1_b)
    p["critic2_w"], p["critic2_b"] = _prep_linear(
        cr2_w, cr2_b, kp=int(p["critic1_w"].shape[1]))
    return p


# ---------------------------------------------------------------------------
if __name__ == "__main__":
    B, seq_len, pred_len = 2, 16, 8
    in_dim, out_dim, inner_s = 4, 4, 8

    key = jax.random.PRNGKey(0)
    k_x, k_params, k_noise = jax.random.split(key, 3)

    x_his = jax.random.normal(k_x, (B, seq_len, in_dim), dtype=jnp.float32)
    params = init_params(k_params, in_dim, out_dim, inner_s)

    xs_pred, xs_rec, elbo_s, mlbo_s = snet_forward(
        params, x_his, mean_inference=False, key=k_noise,
        pred_len=pred_len, out_dim=out_dim, inner_s=inner_s)

    jax.block_until_ready((xs_pred, xs_rec, elbo_s, mlbo_s))
    assert xs_pred.shape == (B, pred_len, out_dim)
    assert xs_rec.shape == (B, seq_len, in_dim)
    assert elbo_s.shape == () and mlbo_s.shape == ()
    assert np.all(np.isfinite(np.asarray(xs_pred)))
    assert np.all(np.isfinite(np.asarray(xs_rec)))
    assert np.isfinite(float(elbo_s)) and np.isfinite(float(mlbo_s))
    print("KERNEL_OK")
</pallas_src>

<mosaic_0001>
module attributes {stable_mosaic.version = 11 : i64} {
  func.func @_linear_kernel_k1(%arg0: i32, %arg1: i32, %arg2: memref<16x8xbf16, #tpu.memory_space<vmem>>, %arg3: memref<8x128xbf16, #tpu.memory_space<vmem>>, %arg4: memref<1x128xf32, #tpu.memory_space<vmem>>, %arg5: memref<16x128xf32, #tpu.memory_space<vmem>>) attributes {dimension_semantics = [#tpu.dimension_semantics<parallel>, #tpu.dimension_semantics<parallel>], iteration_bounds = array<i64: 2, 1>, scalar_prefetch = 0 : i64, scratch_operands = 0 : i64, tpu.core_type = #tpu.core_type<tc>, window_params = [{transform_indices = @transform_0, window_bounds = array<i64: 16, 8>}, {transform_indices = @transform_1, window_bounds = array<i64: 8, 128>}, {transform_indices = @transform_2, window_bounds = array<i64: 1, 128>}, {transform_indices = @transform_3, window_bounds = array<i64: 16, 128>}]} {
    %c0 = arith.constant 0 : index
    %c0_0 = arith.constant 0 : index
    %0 = vector.load %arg2[%c0, %c0_0] : memref<16x8xbf16, #tpu.memory_space<vmem>>, vector<16x8xbf16>
    %c0_1 = arith.constant 0 : index
    %c0_2 = arith.constant 0 : index
    %1 = vector.load %arg3[%c0_1, %c0_2] : memref<8x128xbf16, #tpu.memory_space<vmem>>, vector<8x128xbf16>
    %cst = arith.constant dense<0.000000e+00> : vector<16x128xf32>
    %2 = tpu.matmul %0, %1, %cst {dimension_numbers = #tpu.dot_dimension_numbers<[1], [0], [0], [1], [0, 0, 1, 1], [], []>} : vector<16x8xbf16>, vector<8x128xbf16>, vector<16x128xf32> -> vector<16x128xf32>
    %c0_3 = arith.constant 0 : index
    %c0_4 = arith.constant 0 : index
    %3 = vector.load %arg4[%c0_3, %c0_4] : memref<1x128xf32, #tpu.memory_space<vmem>>, vector<1x128xf32>
    %4 = vector.broadcast %3 : vector<1x128xf32> to vector<16x128xf32>
    %5 = arith.addf %2, %4 : vector<16x128xf32>
    %c128_i32 = arith.constant 128 : i32
    %6 = arith.muli %arg1, %c128_i32 : i32
    %cst_5 = arith.constant 0.000000e+00 : f32
    %7 = vector.broadcast %cst_5 : f32 to vector<16x128xf32>
    %8 = arith.maximumf %5, %7 : vector<16x128xf32>
    %9 = math.absf %5 : vector<16x128xf32>
    %cst_6 = arith.constant 0.000000e+00 : f32
    %10 = vector.broadcast %cst_6 : f32 to vector<16x128xf32>
    %11 = arith.subf %10, %9 : vector<16x128xf32>
    %12 = math.exp %11 : vector<16x128xf32>
    %cst_7 = arith.constant 1.000000e+00 : f32
    %13 = vector.broadcast %cst_7 : f32 to vector<16x128xf32>
    %14 = arith.addf %13, %12 : vector<16x128xf32>
    %15 = math.log %14 : vector<16x128xf32>
    %16 = arith.addf %8, %15 : vector<16x128xf32>
    %17 = tpu.iota {dimensions = array<i32: 1>} : vector<16x128xi32>
    %18 = vector.broadcast %6 : i32 to vector<16x128xi32>
    %19 = arith.addi %18, %17 : vector<16x128xi32>
    %c8_i32 = arith.constant 8 : i32
    %20 = vector.broadcast %c8_i32 : i32 to vector<16x128xi32>
    %21 = arith.cmpi sge, %19, %20 : vector<16x128xi32>
    %22 = arith.select %21, %16, %5 : vector<16x128xi1>, vector<16x128xf32>
    %c0_8 = arith.constant 0 : index
    %c0_9 = arith.constant 0 : index
    %23 = vector.load %arg5[%c0_8, %c0_9] : memref<16x128xf32, #tpu.memory_space<vmem>>, vector<16x128xf32>
    tpu.vector_store %arg5[%c0_8, %c0_9], %22 {strides = array<i32>} : memref<16x128xf32, #tpu.memory_space<vmem>>, vector<16x128xf32>,
    return
  }
  func.func @transform_0(%arg0: i32, %arg1: i32) -> (i32, i32) {
    %c0_i32 = arith.constant 0 : i32
    %c0_i32_0 = arith.constant 0 : i32
    return %arg0, %c0_i32 : i32, i32
  }
  func.func @transform_1(%arg0: i32, %arg1: i32) -> (i32, i32) {
    %c0_i32 = arith.constant 0 : i32
    %c0_i32_0 = arith.constant 0 : i32
    return %c0_i32, %arg1 : i32, i32
  }
  func.func @transform_2(%arg0: i32, %arg1: i32) -> (i32, i32) {
    %c0_i32 = arith.constant 0 : i32
    %c0_i32_0 = arith.constant 0 : i32
    return %c0_i32, %arg1 : i32, i32
  }
  func.func @transform_3(%arg0: i32, %arg1: i32) -> (i32, i32) {
    %c0_i32 = arith.constant 0 : i32
    return %arg0, %arg1 : i32, i32
  }
}

module attributes {stable_mosaic.version = 11 : i64} {
  func.func @_critic_kernel(%arg0: i32, %arg1: memref<32x16xbf16, #tpu.memory_space<vmem>>, %arg2: memref<16x128xbf16, #tpu.memory_space<vmem>>, %arg3: memref<1x128xf32, #tpu.memory_space<vmem>>, %arg4: memref<128x128xbf16, #tpu.memory_space<vmem>>, %arg5: memref<1x128xf32, #tpu.memory_space<vmem>>, %arg6: memref<32x128xf32, #tpu.memory_space<vmem>>) attributes {dimension_semantics = [#tpu.dimension_semantics<parallel>], iteration_bounds = array<i64: 2>, scalar_prefetch = 0 : i64, scratch_operands = 0 : i64, tpu.core_type = #tpu.core_type<tc>, window_params = [{transform_indices = @transform_0, window_bounds = array<i64: 32, 16>}, {pipeline_mode = #tpu.pipeline_mode<synchronous>, transform_indices = @transform_1, window_bounds = array<i64: 16, 128>}, {pipeline_mode = #tpu.pipeline_mode<synchronous>, transform_indices = @transform_2, window_bounds = array<i64: 1, 128>}, {pipeline_mode = #tpu.pipeline_mode<synchronous>, transform_indices = @transform_3, window_bounds = array<i64: 128, 128>}, {pipeline_mode = #tpu.pipeline_mode<synchronous>, transform_indices = @transform_4, window_bounds = array<i64: 1, 128>}, {transform_indices = @transform_5, window_bounds = array<i64: 32, 128>}]} {
    %c0 = arith.constant 0 : index
    %c0_0 = arith.constant 0 : index
    %0 = vector.load %arg1[%c0, %c0_0] : memref<32x16xbf16, #tpu.memory_space<vmem>>, vector<32x16xbf16>
    %c0_1 = arith.constant 0 : index
    %c0_2 = arith.constant 0 : index
    %1 = vector.load %arg2[%c0_1, %c0_2] : memref<16x128xbf16, #tpu.memory_space<vmem>>, vector<16x128xbf16>
    %cst = arith.constant dense<0.000000e+00> : vector<32x128xf32>
    %2 = tpu.matmul %0, %1, %cst {dimension_numbers = #tpu.dot_dimension_numbers<[1], [0], [0], [1], [0, 0, 1, 1], [], []>} : vector<32x16xbf16>, vector<16x128xbf16>, vector<32x128xf32> -> vector<32x128xf32>
    %c0_3 = arith.constant 0 : index
    %c0_4 = arith.constant 0 : index
    %3 = vector.load %arg3[%c0_3, %c0_4] : memref<1x128xf32, #tpu.memory_space<vmem>>, vector<1x128xf32>
    %4 = vector.broadcast %3 : vector<1x128xf32> to vector<32x128xf32>
    %5 = arith.addf %2, %4 : vector<32x128xf32>
    %cst_5 = arith.constant 0.000000e+00 : f32
    %6 = vector.broadcast %cst_5 : f32 to vector<32x128xf32>
    %7 = arith.maximumf %5, %6 : vector<32x128xf32>
    %8 = arith.truncf %7 : vector<32x128xf32> to vector<32x128xbf16>
    %c0_6 = arith.constant 0 : index
    %c0_7 = arith.constant 0 : index
    %9 = vector.load %arg4[%c0_6, %c0_7] : memref<128x128xbf16, #tpu.memory_space<vmem>>, vector<128x128xbf16>
    %cst_8 = arith.constant dense<0.000000e+00> : vector<32x128xf32>
    %10 = tpu.matmul %8, %9, %cst_8 {dimension_numbers = #tpu.dot_dimension_numbers<[1], [0], [0], [1], [0, 0, 1, 1], [], []>} : vector<32x128xbf16>, vector<128x128xbf16>, vector<32x128xf32> -> vector<32x128xf32>
    %c0_9 = arith.constant 0 : index
    %c0_10 = arith.constant 0 : index
    %11 = vector.load %arg5[%c0_9, %c0_10] : memref<1x128xf32, #tpu.memory_space<vmem>>, vector<1x128xf32>
    %12 = vector.broadcast %11 : vector<1x128xf32> to vector<32x128xf32>
    %13 = arith.addf %10, %12 : vector<32x128xf32>
    %cst_11 = arith.constant 0.000000e+00 : f32
    %14 = vector.broadcast %cst_11 : f32 to vector<32x128xf32>
    %15 = arith.subf %14, %13 : vector<32x128xf32>
    %16 = math.exp %15 : vector<32x128xf32>
    %cst_12 = arith.constant 1.000000e+00 : f32
    %17 = vector.broadcast %cst_12 : f32 to vector<32x128xf32>
    %18 = arith.addf %17, %16 : vector<32x128xf32>
    %19 = tpu.reciprocal %18 {approx = true} : vector<32x128xf32> -> vector<32x128xf32>
    %c0_13 = arith.constant 0 : index
    %c0_14 = arith.constant 0 : index
    %20 = vector.load %arg6[%c0_13, %c0_14] : memref<32x128xf32, #tpu.memory_space<vmem>>, vector<32x128xf32>
    tpu.vector_store %arg6[%c0_13, %c0_14], %19 {strides = array<i32>} : memref<32x128xf32, #tpu.memory_space<vmem>>, vector<32x128xf32>,
    return
  }
  func.func @transform_0(%arg0: i32) -> (i32, i32) {
    %c0_i32 = arith.constant 0 : i32
    %c0_i32_0 = arith.constant 0 : i32
    return %arg0, %c0_i32 : i32, i32
  }
  func.func @transform_1(%arg0: i32) -> (i32, i32) {
    %c0_i32 = arith.constant 0 : i32
    %c0_i32_0 = arith.constant 0 : i32
    %c0_i32_1 = arith.constant 0 : i32
    return %c0_i32, %c0_i32_0 : i32, i32
  }
  func.func @transform_2(%arg0: i32) -> (i32, i32) {
    %c0_i32 = arith.constant 0 : i32
    %c0_i32_0 = arith.constant 0 : i32
    %c0_i32_1 = arith.constant 0 : i32
    return %c0_i32, %c0_i32_0 : i32, i32
  }
  func.func @transform_3(%arg0: i32) -> (i32, i32) {
    %c0_i32 = arith.constant 0 : i32
    %c0_i32_0 = arith.constant 0 : i32
    %c0_i32_1 = arith.constant 0 : i32
    return %c0_i32, %c0_i32_0 : i32, i32
  }
  func.func @transform_4(%arg0: i32) -> (i32, i32) {
    %c0_i32 = arith.constant 0 : i32
    %c0_i32_0 = arith.constant 0 : i32
    %c0_i32_1 = arith.constant 0 : i32
    return %c0_i32, %c0_i32_0 : i32, i32
  }
  func.func @transform_5(%arg0: i32) -> (i32, i32) {
    %c0_i32 = arith.constant 0 : i32
    %c0_i32_0 = arith.constant 0 : i32
    return %arg0, %c0_i32 : i32, i32
  }
}

module attributes {stable_mosaic.version = 11 : i64} {
  func.func @_linear_kernel_k1(%arg0: i32, %arg1: i32, %arg2: memref<16x8xbf16, #tpu.memory_space<vmem>>, %arg3: memref<8x128xbf16, #tpu.memory_space<vmem>>, %arg4: memref<1x128xf32, #tpu.memory_space<vmem>>, %arg5: memref<16x128xf32, #tpu.memory_space<vmem>>) attributes {dimension_semantics = [#tpu.dimension_semantics<parallel>, #tpu.dimension_semantics<parallel>], iteration_bounds = array<i64: 2, 1>, scalar_prefetch = 0 : i64, scratch_operands = 0 : i64, tpu.core_type = #tpu.core_type<tc>, window_params = [{transform_indices = @transform_0, window_bounds = array<i64: 16, 8>}, {transform_indices = @transform_1, window_bounds = array<i64: 8, 128>}, {transform_indices = @transform_2, window_bounds = array<i64: 1, 128>}, {transform_indices = @transform_3, window_bounds = array<i64: 16, 128>}]} {
    %c0 = arith.constant 0 : index
    %c0_0 = arith.constant 0 : index
    %0 = vector.load %arg2[%c0, %c0_0] : memref<16x8xbf16, #tpu.memory_space<vmem>>, vector<16x8xbf16>
    %c0_1 = arith.constant 0 : index
    %c0_2 = arith.constant 0 : index
    %1 = vector.load %arg3[%c0_1, %c0_2] : memref<8x128xbf16, #tpu.memory_space<vmem>>, vector<8x128xbf16>
    %cst = arith.constant dense<0.000000e+00> : vector<16x128xf32>
    %2 = tpu.matmul %0, %1, %cst {dimension_numbers = #tpu.dot_dimension_numbers<[1], [0], [0], [1], [0, 0, 1, 1], [], []>} : vector<16x8xbf16>, vector<8x128xbf16>, vector<16x128xf32> -> vector<16x128xf32>
    %c0_3 = arith.constant 0 : index
    %c0_4 = arith.constant 0 : index
    %3 = vector.load %arg4[%c0_3, %c0_4] : memref<1x128xf32, #tpu.memory_space<vmem>>, vector<1x128xf32>
    %4 = vector.broadcast %3 : vector<1x128xf32> to vector<16x128xf32>
    %5 = arith.addf %2, %4 : vector<16x128xf32>
    %c0_5 = arith.constant 0 : index
    %c0_6 = arith.constant 0 : index
    %6 = vector.load %arg5[%c0_5, %c0_6] : memref<16x128xf32, #tpu.memory_space<vmem>>, vector<16x128xf32>
    tpu.vector_store %arg5[%c0_5, %c0_6], %5 {strides = array<i32>} : memref<16x128xf32, #tpu.memory_space<vmem>>, vector<16x128xf32>,
    return
  }
  func.func @transform_0(%arg0: i32, %arg1: i32) -> (i32, i32) {
    %c0_i32 = arith.constant 0 : i32
    %c0_i32_0 = arith.constant 0 : i32
    return %arg0, %c0_i32 : i32, i32
  }
  func.func @transform_1(%arg0: i32, %arg1: i32) -> (i32, i32) {
    %c0_i32 = arith.constant 0 : i32
    %c0_i32_0 = arith.constant 0 : i32
    return %c0_i32, %arg1 : i32, i32
  }
  func.func @transform_2(%arg0: i32, %arg1: i32) -> (i32, i32) {
    %c0_i32 = arith.constant 0 : i32
    %c0_i32_0 = arith.constant 0 : i32
    return %c0_i32, %arg1 : i32, i32
  }
  func.func @transform_3(%arg0: i32, %arg1: i32) -> (i32, i32) {
    %c0_i32 = arith.constant 0 : i32
    return %arg0, %arg1 : i32, i32
  }
}

module attributes {stable_mosaic.version = 11 : i64} {
  func.func @_linear_kernel_k1(%arg0: i32, %arg1: i32, %arg2: memref<8x8xbf16, #tpu.memory_space<vmem>>, %arg3: memref<8x128xbf16, #tpu.memory_space<vmem>>, %arg4: memref<1x128xf32, #tpu.memory_space<vmem>>, %arg5: memref<8x128xf32, #tpu.memory_space<vmem>>) attributes {dimension_semantics = [#tpu.dimension_semantics<parallel>, #tpu.dimension_semantics<parallel>], iteration_bounds = array<i64: 2, 1>, scalar_prefetch = 0 : i64, scratch_operands = 0 : i64, tpu.core_type = #tpu.core_type<tc>, window_params = [{transform_indices = @transform_0, window_bounds = array<i64: 8, 8>}, {transform_indices = @transform_1, window_bounds = array<i64: 8, 128>}, {transform_indices = @transform_2, window_bounds = array<i64: 1, 128>}, {transform_indices = @transform_3, window_bounds = array<i64: 8, 128>}]} {
    %c0 = arith.constant 0 : index
    %c0_0 = arith.constant 0 : index
    %0 = vector.load %arg2[%c0, %c0_0] : memref<8x8xbf16, #tpu.memory_space<vmem>>, vector<8x8xbf16>
    %c0_1 = arith.constant 0 : index
    %c0_2 = arith.constant 0 : index
    %1 = vector.load %arg3[%c0_1, %c0_2] : memref<8x128xbf16, #tpu.memory_space<vmem>>, vector<8x128xbf16>
    %cst = arith.constant dense<0.000000e+00> : vector<8x128xf32>
    %2 = tpu.matmul %0, %1, %cst {dimension_numbers = #tpu.dot_dimension_numbers<[1], [0], [0], [1], [0, 0, 1, 1], [], []>} : vector<8x8xbf16>, vector<8x128xbf16>, vector<8x128xf32> -> vector<8x128xf32>
    %c0_3 = arith.constant 0 : index
    %c0_4 = arith.constant 0 : index
    %3 = vector.load %arg4[%c0_3, %c0_4] : memref<1x128xf32, #tpu.memory_space<vmem>>, vector<1x128xf32>
    %4 = vector.broadcast %3 : vector<1x128xf32> to vector<8x128xf32>
    %5 = arith.addf %2, %4 : vector<8x128xf32>
    %c0_5 = arith.constant 0 : index
    %c0_6 = arith.constant 0 : index
    %6 = vector.load %arg5[%c0_5, %c0_6] : memref<8x128xf32, #tpu.memory_space<vmem>>, vector<8x128xf32>
    tpu.vector_store %arg5[%c0_5, %c0_6], %5 {strides = array<i32>} : memref<8x128xf32, #tpu.memory_space<vmem>>, vector<8x128xf32>,
    return
  }
  func.func @transform_0(%arg0: i32, %arg1: i32) -> (i32, i32) {
    %c0_i32 = arith.constant 0 : i32
    %c0_i32_0 = arith.constant 0 : i32
    return %arg0, %c0_i32 : i32, i32
  }
  func.func @transform_1(%arg0: i32, %arg1: i32) -> (i32, i32) {
    %c0_i32 = arith.constant 0 : i32
    %c0_i32_0 = arith.constant 0 : i32
    return %c0_i32, %arg1 : i32, i32
  }
  func.func @transform_2(%arg0: i32, %arg1: i32) -> (i32, i32) {
    %c0_i32 = arith.constant 0 : i32
    %c0_i32_0 = arith.constant 0 : i32
    return %c0_i32, %arg1 : i32, i32
  }
  func.func @transform_3(%arg0: i32, %arg1: i32) -> (i32, i32) {
    %c0_i32 = arith.constant 0 : i32
    return %arg0, %arg1 : i32, i32
  }
}

</mosaic_0001>

<bundles_post_ra>
// kernel: reverse.5
= control target key start
LH: loop header
LB: loop body
LE: loop exit
PB: predicated region body
PF: predicated region fallthrough
CT: control target
= control target key end

     0   :  { %v2_v0 = vlaneseq  ;;  %s2070_s0 = inlined_call_operand.vmem [shape: bf16[11,11,4,4], index: 0, kind: input, shape index: {}]   ;;  %s2071_s1 = inlined_call_operand.vmem [shape: bf16[11,11,4,4], index: 1, kind: output, shape index: {}]  }
   0x2   :  { %v3_v1 = vsub.s32 10, %v2_v0 }
   0x4   :  { %4 = vset.pattern.permute.xlu0 %v3_v1 }
   0x5   :  { %1843 = vset.pattern.permute.xlu1 %v3_v1  ;;  %v105_v2 = vld [vmem:[%s2070_s0 + $0x50] sm:$0xff]   ;;  %v95_v3 = vld [vmem:[%s2070_s0 + $0x46] sm:$0xff]   ;;  %v99_v4 = vld [vmem:[%s2070_s0 + $0x4e] sm:$0x3] }
   0x6   :  { %106 = vst [vmem:[#allocation1 + $0x50] sm:$0xff] %v105_v2   ;;  %96 = vst [vmem:[#allocation1 + $0x46] sm:$0xff] %v95_v3   ;;  %v87_v5 = vld [vmem:[%s2070_s0 + $0x3e] sm:$0xff]   ;;  %v79_v6 = vld [vmem:[%s2070_s0 + $0x36] sm:$0xff]  }
   0x7   :  { %100 = vst [vmem:[#allocation1 + $0x4e] sm:$0x3] %v99_v4  ;;  %v71_v7 = vld [vmem:[%s2070_s0 + $0x2e] sm:$0xff]   ;;  %88 = vst [vmem:[#allocation1 + $0x3e] sm:$0xff] %v87_v5   ;;  %v63_v8 = vld [vmem:[%s2070_s0 + $0x26] sm:$0xff]  }
   0x8   :  { %80 = vst [vmem:[#allocation1 + $0x36] sm:$0xff] %v79_v6   ;;  %72 = vst [vmem:[#allocation1 + $0x2e] sm:$0xff] %v71_v7   ;;  %v55_v9 = vld [vmem:[%s2070_s0 + $0x1e] sm:$0xff]   ;;  %v47_v10 = vld [vmem:[%s2070_s0 + $0x16] sm:$0xff]  }
   0x9   :  { %64 = vst [vmem:[#allocation1 + $0x26] sm:$0xff] %v63_v8   ;;  %56 = vst [vmem:[#allocation1 + $0x1e] sm:$0xff] %v55_v9   ;;  %v39_v11 = vld [vmem:[%s2070_s0 + $0xe] sm:$0xff]   ;;  %v31_v12 = vld [vmem:[%s2070_s0 + $0x6] sm:$0xff]  }
   0xa   :  { %48 = vst [vmem:[#allocation1 + $0x16] sm:$0xff] %v47_v10   ;;  %v23_v13 = vld [vmem:[%s2070_s0 + $0x2] sm:$0xf]   ;;  %40 = vst [vmem:[#allocation1 + $0xe] sm:$0xff] %v39_v11   ;;  %v21_v14 = vld [vmem:[%s2070_s0] sm:$0x3] }
   0xb   :  { %32 = vst [vmem:[#allocation1 + $0x6] sm:$0xff] %v31_v12   ;;  %24 = vst [vmem:[#allocation1 + $0x2] sm:$0xf] %v23_v13  }
   0xc   :  { %22 = vst [vmem:[#allocation1] sm:$0x3] %v21_v14 }
   0xd   :  { %v249_v15 = vld [vmem:[#allocation1 + $0x54] sm:$0x3]  ;;  %v281_v16 = vld [vmem:[#allocation1 + $0x50] sm:$0x3]  ;;  %v233_v17 = vld [vmem:[#allocation1 + $0x56] sm:$0x3] }
   0xe   :  { %v250_v18 = vunpack.c.l.bf16 %v249_v15  ;;  %v282_v19 = vunpack.c.l.bf16 %v281_v16  ;;  %v234_v20 = vunpack.c.l.bf16 %v233_v17  ;;  %v265_v21 = vld [vmem:[#allocation1 + $0x52] sm:$0x3]  ;;  %v329_v22 = vld [vmem:[#allocation1 + $0x4a] sm:$0x3]  ;;  %v345_v23 = vld [vmem:[#allocation1 + $0x48] sm:$0x3] }
   0xf   :  { %v266_v24 = vunpack.c.l.bf16 %v265_v21  ;;  %v330_v25 = vunpack.c.l.bf16 %v329_v22  ;;  %v346_v26 = vunpack.c.l.bf16 %v345_v23  ;;  %v297_v27 = vld [vmem:[#allocation1 + $0x4e] sm:$0x3]  ;;  %v313_v28 = vld [vmem:[#allocation1 + $0x4c] sm:$0x3]  ;;  %v393_v29 = vld [vmem:[#allocation1 + $0x42] sm:$0x3] }
  0x10   :  { %253 = vst [vmem:[#allocation0 + $0x88] sm:$0xf] %v250_v18  ;;  %285 = vst [vmem:[#allocation0 + $0x110] sm:$0xf] %v282_v19  ;;  %v298_v30 = vunpack.c.l.bf16 %v297_v27  ;;  %v314_v31 = vunpack.c.l.bf16 %v313_v28  ;;  %v394_v32 = vunpack.c.l.bf16 %v393_v29  ;;  %v409_v33 = vld [vmem:[#allocation1 + $0x40] sm:$0x3] }
  0x11   :  { %237 = vst [vmem:[#allocation0 + $0xa8] sm:$0xf] %v234_v20  ;;  %v361_v34 = vld [vmem:[#allocation1 + $0x46] sm:$0x3]  ;;  %v377_v35 = vld [vmem:[#allocation1 + $0x44] sm:$0x3]  ;;  %v410_v36 = vunpack.c.l.bf16 %v409_v33 }
  0x12   :  { %269 = vst [vmem:[#allocation0 + $0x148] sm:$0xf] %v266_v24  ;;  %333 = vst [vmem:[#allocation0 + $0x60] sm:$0xf] %v330_v25  ;;  %v362_v37 = vunpack.c.l.bf16 %v361_v34  ;;  %v378_v38 = vunpack.c.l.bf16 %v377_v35  ;;  %v457_v39 = vld [vmem:[#allocation1 + $0x3a] sm:$0x3] }
  0x13   :  { %349 = vst [vmem:[#allocation0 + $0x58] sm:$0xf] %v346_v26  ;;  %v473_v40 = vld [vmem:[#allocation1 + $0x38] sm:$0x3]  ;;  %v425_v41 = vld [vmem:[#allocation1 + $0x3e] sm:$0x3]  ;;  %v458_v42 = vunpack.c.l.bf16 %v457_v39 }
  0x14   :  { %301 = vst [vmem:[#allocation0 + $0x38] sm:$0xf] %v298_v30  ;;  %317 = vst [vmem:[#allocation0 + $0x120] sm:$0xf] %v314_v31  ;;  %v474_v43 = vunpack.c.l.bf16 %v473_v40  ;;  %v426_v44 = vunpack.c.l.bf16 %v425_v41  ;;  %v441_v45 = vld [vmem:[#allocation1 + $0x3c] sm:$0x3] }
  0x15   :  { %397 = vst [vmem:[#allocation0 + $0x20] sm:$0xf] %v394_v32  ;;  %v521_v46 = vld [vmem:[#allocation1 + $0x32] sm:$0x3]  ;;  %v537_v47 = vld [vmem:[#allocation1 + $0x30] sm:$0x3]  ;;  %v442_v48 = vunpack.c.l.bf16 %v441_v45 }
  0x16   :  { %413 = vst [vmem:[#allocation0 + $0x68] sm:$0xf] %v410_v36  ;;  %365 = vst [vmem:[#allocation0 + $0xd8] sm:$0xf] %v362_v37  ;;  %v522_v49 = vunpack.c.l.bf16 %v521_v46  ;;  %v538_v50 = vunpack.c.l.bf16 %v537_v47  ;;  %v489_v51 = vld [vmem:[#allocation1 + $0x36] sm:$0x3] }
  0x17   :  { %381 = vst [vmem:[#allocation0 + $0x50] sm:$0xf] %v378_v38  ;;  %v505_v52 = vld [vmem:[#allocation1 + $0x34] sm:$0x3]  ;;  %v585_v53 = vld [vmem:[#allocation1 + $0x2a] sm:$0x3]  ;;  %v490_v54 = vunpack.c.l.bf16 %v489_v51 }
  0x18   :  { %461 = vst [vmem:[#allocation0 + $0xe8] sm:$0xf] %v458_v42  ;;  %477 = vst [vmem:[#allocation0 + $0x138] sm:$0xf] %v474_v43  ;;  %v506_v55 = vunpack.c.l.bf16 %v505_v52  ;;  %v586_v56 = vunpack.c.l.bf16 %v585_v53  ;;  %v601_v57 = vld [vmem:[#allocation1 + $0x28] sm:$0x3] }
  0x19   :  { %429 = vst [vmem:[#allocation0 + $0x140] sm:$0xf] %v426_v44  ;;  %v553_v58 = vld [vmem:[#allocation1 + $0x2e] sm:$0x3]  ;;  %v569_v59 = vld [vmem:[#allocation1 + $0x2c] sm:$0x3]  ;;  %v602_v60 = vunpack.c.l.bf16 %v601_v57 }
  0x1a   :  { %445 = vst [vmem:[#allocation0 + $0x90] sm:$0xf] %v442_v48  ;;  %525 = vst [vmem:[#allocation0 + $0x150] sm:$0xf] %v522_v49  ;;  %v554_v61 = vunpack.c.l.bf16 %v553_v58  ;;  %v570_v62 = vunpack.c.l.bf16 %v569_v59  ;;  %v649_v63 = vld [vmem:[#allocation1 + $0x22] sm:$0x3] }
  0x1b   :  { %541 = vst [vmem:[#allocation0 + $0xc0] sm:$0xf] %v538_v50  ;;  %v665_v0 = vld [vmem:[#allocation1 + $0x20] sm:$0x3]  ;;  %v617_v1 = vld [vmem:[#allocation1 + $0x26] sm:$0x3]  ;;  %v650_v2 = vunpack.c.l.bf16 %v649_v63 }
  0x1c   :  { %493 = vst [vmem:[#allocation0 + $0x30] sm:$0xf] %v490_v54  ;;  %509 = vst [vmem:[#allocation0 + $0x48] sm:$0xf] %v506_v55  ;;  %v666_v3 = vunpack.c.l.bf16 %v665_v0  ;;  %v618_v4 = vunpack.c.l.bf16 %v617_v1  ;;  %v633_v5 = vld [vmem:[#allocation1 + $0x24] sm:$0x3] }
  0x1d   :  { %589 = vst [vmem:[#allocation0 + $0x80] sm:$0xf] %v586_v56  ;;  %v713_v6 = vld [vmem:[#allocation1 + $0x1a] sm:$0x3]  ;;  %v729_v7 = vld [vmem:[#allocation1 + $0x18] sm:$0x3]  ;;  %v634_v10 = vunpack.c.l.bf16 %v633_v5 }
  0x1e   :  { %v935_v8 = vld [vmem:[#allocation0 + $0x88] sm:$0xff]  ;;  %v923_v9 = vld [vmem:[#allocation0 + $0x110] sm:$0xff]  ;;  %605 = vst [vmem:[#allocation0 + $0x70] sm:$0xf] %v602_v60  ;;  %557 = vst [vmem:[#allocation0 + $0xb0] sm:$0xf] %v554_v61  ;;  %v714_v11 = vunpack.c.l.bf16 %v713_v6  ;;  %v730_v12 = vunpack.c.l.bf16 %v729_v7 }
  0x1f   :  { %573 = vst [vmem:[#allocation0] sm:$0xf] %v570_v62  ;;  %936 = vperm.xlu1 %1843, %v935_v8   ;;  %924 = vperm.xlu0 %4, %v923_v9   ;;  %653 = vst [vmem:[#allocation0 + $0xc8] sm:$0xf] %v650_v2  ;;  %v941_v13 = vld [vmem:[#allocation0 + $0xa8] sm:$0xff]  ;;  %v953_v15 = vld [vmem:[#allocation0 + $0x60] sm:$0xff] }
  0x20   :  { %669 = vst [vmem:[#allocation0 + $0x158] sm:$0xf] %v666_v3  ;;  %621 = vst [vmem:[#allocation0 + $0x8] sm:$0xf] %v618_v4  ;;  %v929_v14 = vld [vmem:[#allocation0 + $0x148] sm:$0xff]  ;;  %v947_v16 = vld [vmem:[#allocation0 + $0x58] sm:$0xff] }
  0x21   :  { %637 = vst [vmem:[#allocation0 + $0xe0] sm:$0xf] %v634_v10  ;;  %717 = vst [vmem:[#allocation0 + $0x108] sm:$0xf] %v714_v11  ;;  %v965_v17 = vld [vmem:[#allocation0 + $0x38] sm:$0xff]  ;;  %v959_v18 = vld [vmem:[#allocation0 + $0x120] sm:$0xff] }
  0x22   :  { %733 = vst [vmem:[#allocation0 + $0xa0] sm:$0xf] %v730_v12  ;;  %v681_v19 = vld [vmem:[#allocation1 + $0x1e] sm:$0x3]  ;;  %v697_v20 = vld [vmem:[#allocation1 + $0x1c] sm:$0x3] }
  0x23   :  { %942 = vperm.xlu1 %1843, %v941_v13   ;;  %930 = vperm.xlu0 %4, %v929_v14   ;;  %v777_v21 = vld [vmem:[#allocation1 + $0x12] sm:$0x3]  ;;  %v682_v22 = vunpack.c.l.bf16 %v681_v19  ;;  %v698_v23 = vunpack.c.l.bf16 %v697_v20  ;;  %v793_v25 = vld [vmem:[#allocation1 + $0x10] sm:$0x3]  ;;  %v745_v26 = vld [vmem:[#allocation1 + $0x16] sm:$0x3] }
  0x24   :  { %v778_v24 = vunpack.c.l.bf16 %v777_v21  ;;  %v761_v27 = vld [vmem:[#allocation1 + $0x14] sm:$0x3]  ;;  %v977_v28 = vld [vmem:[#allocation0 + $0x20] sm:$0xff]  ;;  %v794_v29 = vunpack.c.l.bf16 %v793_v25  ;;  %v746_v30 = vunpack.c.l.bf16 %v745_v26  ;;  %v841_v32 = vld [vmem:[#allocation1 + $0xa] sm:$0x3] }
  0x25   :  { %v762_v31 = vunpack.c.l.bf16 %v761_v27  ;;  %v857_v33 = vld [vmem:[#allocation1 + $0x8] sm:$0x3]  ;;  %v809_v34 = vld [vmem:[#allocation1 + $0xe] sm:$0x3]  ;;  %685 = vst [vmem:[#allocation0 + $0x40] sm:$0xf] %v682_v22  ;;  %v842_v35 = vunpack.c.l.bf16 %v841_v32 }
  0x26   :  { %701 = vst [vmem:[#allocation0 + $0x28] sm:$0xf] %v698_v23  ;;  %781 = vst [vmem:[#allocation0 + $0xd0] sm:$0xf] %v778_v24  ;;  %v858_v36 = vunpack.c.l.bf16 %v857_v33  ;;  %v810_v37 = vunpack.c.l.bf16 %v809_v34  ;;  %v825_v38 = vld [vmem:[#allocation1 + $0xc] sm:$0x3] }
  0x27   :  { %954 = vperm.xlu1 %1843, %v953_v15   ;;  %948 = vperm.xlu0 %4, %v947_v16   ;;  %v904_v39 = vld [vmem:[#allocation1 + $0x2] sm:$0x3]  ;;  %v918_v40 = vld [vmem:[#allocation1] sm:$0x3]  ;;  %v971_v41 = vld [vmem:[#allocation0 + $0x68] sm:$0xff]  ;;  %v826_v42 = vunpack.c.l.bf16 %v825_v38  ;;  %v1844_v27 = vmov 0.0  }
  0x28   :  { %797 = vst [vmem:[#allocation0 + $0xf8] sm:$0xf] %v794_v29  ;;  %749 = vst [vmem:[#allocation0 + $0x78] sm:$0xf] %v746_v30  ;;  %v905_v43 = vunpack.c.l.bf16 %v904_v39  ;;  %v919_v44 = vunpack.c.l.bf16 %v918_v40  ;;  %v873_v45 = vld [vmem:[#allocation1 + $0x6] sm:$0x3] }
  0x29   :  { %765 = vst [vmem:[#allocation0 + $0xb8] sm:$0xf] %v762_v31  ;;  %v889_v46 = vld [vmem:[#allocation1 + $0x4] sm:$0x3]  ;;  %845 = vst [vmem:[#allocation0 + $0x130] sm:$0xf] %v842_v35  ;;  %v874_v47 = vunpack.c.l.bf16 %v873_v45 }
  0x2a   :  { %861 = vst [vmem:[#allocation0 + $0x118] sm:$0xf] %v858_v36  ;;  %813 = vst [vmem:[#allocation0 + $0x100] sm:$0xf] %v810_v37  ;;  %v890_v48 = vunpack.c.l.bf16 %v889_v46  ;;  %v989_v49 = vld [vmem:[#allocation0 + $0xd8] sm:$0xff]  ;;  %v983_v50 = vld [vmem:[#allocation0 + $0x50] sm:$0xff] }
  0x2b   :  { %966 = vperm.xlu1 %1843, %v965_v17   ;;  %960 = vperm.xlu0 %4, %v959_v18   ;;  %829 = vst [vmem:[#allocation0 + $0x10] sm:$0xf] %v826_v42  ;;  %908 = vst [vmem:[#allocation0 + $0x98] sm:$0xf] %v905_v43  ;;  %v1001_v51 = vld [vmem:[#allocation0 + $0xe8] sm:$0xff]  ;;  %v995_v52 = vld [vmem:[#allocation0 + $0x138] sm:$0xff] }
  0x2c   :  { %921 = vst [vmem:[#allocation0 + $0x128] sm:$0xf] %v919_v44  ;;  %877 = vst [vmem:[#allocation0 + $0xf0] sm:$0xf] %v874_v47  ;;  %v1013_v53 = vld [vmem:[#allocation0 + $0x140] sm:$0xff]  ;;  %v1007_v54 = vld [vmem:[#allocation0 + $0x90] sm:$0xff] }
  0x2d   :  { %893 = vst [vmem:[#allocation0 + $0x18] sm:$0xf] %v890_v48  ;;  %v1025_v55 = vld [vmem:[#allocation0 + $0x150] sm:$0xff]  ;;  %v1019_v56 = vld [vmem:[#allocation0 + $0xc0] sm:$0xff]  ;;  %v1031_v58 = vld [vmem:[#allocation0 + $0x48] sm:$0xff] }
  0x2e   :  { %v1037_v57 = vld [vmem:[#allocation0 + $0x30] sm:$0xff]  ;;  %v1049_v59 = vld [vmem:[#allocation0 + $0x80] sm:$0xff]  ;;  %v1073_v63 = vld [vmem:[#allocation0 + $0xc8] sm:$0xff] }
  0x2f   :  { %978 = vperm.xlu1 %1843, %v977_v28   ;;  %972 = vperm.xlu0 %4, %v971_v41   ;;  %v1043_v60 = vld [vmem:[#allocation0 + $0x70] sm:$0xff]  ;;  %v1055_v62 = vld [vmem:[#allocation0] sm:$0xff]  ;;  %v1067_v0 = vld [vmem:[#allocation0 + $0x158] sm:$0xff] }
  0x30   :  { %v1061_v61 = vld [vmem:[#allocation0 + $0xb0] sm:$0xff]  ;;  %v1085_v1 = vld [vmem:[#allocation0 + $0x8] sm:$0xff]  ;;  %v1079_v2 = vld [vmem:[#allocation0 + $0xe0] sm:$0xff] }
  0x31   :  { %v1097_v3 = vld [vmem:[#allocation0 + $0x108] sm:$0xff]  ;;  %v1091_v4 = vld [vmem:[#allocation0 + $0xa0] sm:$0xff]  ;;  %v1121_v7 = vld [vmem:[#allocation0 + $0xd0] sm:$0xff] }
  0x32   :  { %v1109_v5 = vld [vmem:[#allocation0 + $0x40] sm:$0xff]  ;;  %v1103_v6 = vld [vmem:[#allocation0 + $0x28] sm:$0xff]  ;;  %v1115_v8 = vld [vmem:[#allocation0 + $0xf8] sm:$0xff] }
  0x33   :  { %990 = vperm.xlu1 %1843, %v989_v49   ;;  %984 = vperm.xlu0 %4, %v983_v50   ;;  %v1133_v9 = vld [vmem:[#allocation0 + $0x78] sm:$0xff]  ;;  %v1145_v11 = vld [vmem:[#allocation0 + $0x130] sm:$0xff]  ;;  %v1157_v13 = vld [vmem:[#allocation0 + $0x100] sm:$0xff] }
  0x34   :  { %v1127_v10 = vld [vmem:[#allocation0 + $0xb8] sm:$0xff]  ;;  %v1151_v14 = vld [vmem:[#allocation0 + $0x10] sm:$0xff]  ;;  %v1162_v16 = vld [vmem:[#allocation0 + $0x128] sm:$0xff] }
  0x35   :  { %v1139_v12 = vld [vmem:[#allocation0 + $0x118] sm:$0xff]  ;;  %v1180_v17 = vld [vmem:[#allocation0 + $0xf0] sm:$0xff] }
  0x36   :  { %v1168_v15 = vld [vmem:[#allocation0 + $0x98] sm:$0xff] }
  0x37   :  { %1002 = vperm.xlu1 %1843, %v1001_v51   ;;  %996 = vperm.xlu0 %4, %v995_v52   ;;  %v1174_v18 = vld [vmem:[#allocation0 + $0x18] sm:$0xff] }
  0x3b   :  { %1014 = vperm.xlu1 %1843, %v1013_v53   ;;  %1008 = vperm.xlu0 %4, %v1007_v54  }
  0x3f   :  { %1026 = vperm.xlu1 %1843, %v1025_v55   ;;  %1020 = vperm.xlu0 %4, %v1019_v56  }
  0x43   :  { %1038 = vperm.xlu1 %1843, %v1037_v57   ;;  %1032 = vperm.xlu0 %4, %v1031_v58  }
  0x47   :  { %1050 = vperm.xlu1 %1843, %v1049_v59   ;;  %1044 = vperm.xlu0 %4, %v1043_v60  }
  0x4b   :  { %1062 = vperm.xlu1 %1843, %v1061_v61   ;;  %1056 = vperm.xlu0 %4, %v1055_v62  }
  0x4f   :  { %1074 = vperm.xlu1 %1843, %v1073_v63   ;;  %1068 = vperm.xlu0 %4, %v1067_v0  }
  0x53   :  { %1086 = vperm.xlu1 %1843, %v1085_v1   ;;  %1080 = vperm.xlu0 %4, %v1079_v2  }
  0x57   :  { %1098 = vperm.xlu1 %1843, %v1097_v3   ;;  %1092 = vperm.xlu0 %4, %v1091_v4  }
  0x5b   :  { %1110 = vperm.xlu1 %1843, %v1109_v5   ;;  %1104 = vperm.xlu0 %4, %v1103_v6  }
  0x5f   :  { %1122 = vperm.xlu1 %1843, %v1121_v7   ;;  %1116 = vperm.xlu0 %4, %v1115_v8  }
  0x63   :  { %1134 = vperm.xlu1 %1843, %v1133_v9   ;;  %1128 = vperm.xlu0 %4, %v1127_v10  }
  0x67   :  { %1146 = vperm.xlu1 %1843, %v1145_v11   ;;  %1140 = vperm.xlu0 %4, %v1139_v12  }
  0x6b   :  { %1158 = vperm.xlu1 %1843, %v1157_v13   ;;  %1152 = vperm.xlu0 %4, %v1151_v14  }
  0x6f   :  { %1169 = vperm.xlu1 %1843, %v1168_v15   ;;  %1163 = vperm.xlu0 %4, %v1162_v16  }
  0x73   :  { %1181 = vperm.xlu1 %1843, %v1180_v17   ;;  %1175 = vperm.xlu0 %4, %v1174_v18  }
  0x9a   :  { %v937_v19 = vpop.permute.xlu1 %936  ;;  %v925_v20 = vpop.permute.xlu0 %924 }
  0x9b   :  { %938 = vst [vmem:[#allocation2 + $0x88] sm:$0xff] %v937_v19  ;;  %926 = vst [vmem:[#allocation2 + $0xb0] sm:$0xff] %v925_v20 }
  0x9e   :  { %v943_v21 = vpop.permute.xlu1 %942  ;;  %v931_v22 = vpop.permute.xlu0 %930 }
  0x9f   :  { %944 = vst [vmem:[#allocation2 + $0x108] sm:$0xff] %v943_v21  ;;  %932 = vst [vmem:[#allocation2 + $0xc0] sm:$0xff] %v931_v22 }
  0xa2   :  { %v1202_v23 = vld [vmem:[#allocation2 + $0x88] sm:$0xf]  ;;  %v1189_v24 = vld [vmem:[#allocation2 + $0xb0] sm:$0xf]  ;;  %v955_v25 = vpop.permute.xlu1 %954  ;;  %v949_v26 = vpop.permute.xlu0 %948 }
  0xa3   :  { %v1203_v28 = vpack.c.bf16 %v1844_v27, %v1202_v23  ;;  %v1190_v29 = vpack.c.bf16 %v1844_v27, %v1189_v24  ;;  %956 = vst [vmem:[#allocation2 + $0x90] sm:$0xff] %v955_v25  ;;  %950 = vst [vmem:[#allocation2 + $0x28] sm:$0xff] %v949_v26 }
  0xa5   :  { %1208 = vst [vmem:[#allocation3 + $0x4] sm:$0x3] %v1203_v28  ;;  %1193 = vst [vmem:[#allocation3] sm:$0x3] %v1190_v29 }
  0xa6   :  { %v1210_v30 = vld [vmem:[#allocation2 + $0x108] sm:$0xf]  ;;  %v1195_v31 = vld [vmem:[#allocation2 + $0xc0] sm:$0xf]  ;;  %v967_v32 = vpop.permute.xlu1 %966  ;;  %v961_v33 = vpop.permute.xlu0 %960 }
  0xa7   :  { %v1211_v34 = vpack.c.bf16 %v1844_v27, %v1210_v30  ;;  %v1196_v35 = vpack.c.bf16 %v1844_v27, %v1195_v31  ;;  %968 = vst [vmem:[#allocation2 + $0x150] sm:$0xff] %v967_v32  ;;  %962 = vst [vmem:[#allocation2 + $0x118] sm:$0xff] %v961_v33 }
  0xa9   :  { %1216 = vst [vmem:[#allocation3 + $0x6] sm:$0x3] %v1211_v34  ;;  %1200 = vst [vmem:[#allocation3 + $0x2] sm:$0x3] %v1196_v35 }
  0xaa   :  { %v1226_v36 = vld [vmem:[#allocation2 + $0x90] sm:$0xf]  ;;  %v1218_v37 = vld [vmem:[#allocation2 + $0x28] sm:$0xf]  ;;  %v979_v38 = vpop.permute.xlu1 %978  ;;  %v973_v39 = vpop.permute.xlu0 %972 }
  0xab   :  { %v1227_v40 = vpack.c.bf16 %v1844_v27, %v1226_v36  ;;  %v1219_v41 = vpack.c.bf16 %v1844_v27, %v1218_v37  ;;  %980 = vst [vmem:[#allocation2] sm:$0xff] %v979_v38  ;;  %974 = vst [vmem:[#allocation2 + $0xc8] sm:$0xff] %v973_v39 }
  0xac   :  { %v1557_v42 = vld [vmem:[#allocation3 + $0x4] sm:$0x3]  ;;  %v1553_v43 = vld [vmem:[#allocation3] sm:$0x3] }
  0xad   :  { %1558 = vst [vmem:[%s2071_s1 + $0x4] sm:$0x3] %v1557_v42  ;;  %1554 = vst [vmem:[%s2071_s1] sm:$0x3] %v1553_v43 }
  0xae   :  { %1232 = vst [vmem:[#allocation3 + $0xa] sm:$0x3] %v1227_v40  ;;  %1224 = vst [vmem:[#allocation3 + $0x8] sm:$0x3] %v1219_v41  ;;  %v1242_v44 = vld [vmem:[#allocation2 + $0x150] sm:$0xf]  ;;  %v991_v46 = vpop.permute.xlu1 %990  ;;  %v985_v47 = vpop.permute.xlu0 %984 }
  0xaf   :  { %v1234_v45 = vld [vmem:[#allocation2 + $0x118] sm:$0xf]  ;;  %v1243_v48 = vpack.c.bf16 %v1844_v27, %v1242_v44  ;;  %992 = vst [vmem:[#allocation2 + $0xf8] sm:$0xff] %v991_v46  ;;  %986 = vst [vmem:[#allocation2 + $0xa8] sm:$0xff] %v985_v47 }
  0xb0   :  { %v1235_v49 = vpack.c.bf16 %v1844_v27, %v1234_v45  ;;  %v1559_v50 = vld [vmem:[#allocation3 + $0x6] sm:$0x3]  ;;  %v1555_v51 = vld [vmem:[#allocation3 + $0x2] sm:$0x3] }
  0xb1   :  { %1560 = vst [vmem:[%s2071_s1 + $0x6] sm:$0x3] %v1559_v50  ;;  %1556 = vst [vmem:[%s2071_s1 + $0x2] sm:$0x3] %v1555_v51 }
  0xb2   :  { %1248 = vst [vmem:[#allocation3 + $0xe] sm:$0x3] %v1243_v48  ;;  %1240 = vst [vmem:[#allocation3 + $0xc] sm:$0x3] %v1235_v49  ;;  %v1258_v52 = vld [vmem:[#allocation2] sm:$0xf]  ;;  %v1003_v54 = vpop.permute.xlu1 %1002  ;;  %v997_v55 = vpop.permute.xlu0 %996 }
  0xb3   :  { %v1250_v53 = vld [vmem:[#allocation2 + $0xc8] sm:$0xf]  ;;  %v1259_v56 = vpack.c.bf16 %v1844_v27, %v1258_v52  ;;  %1004 = vst [vmem:[#allocation2 + $0xd0] sm:$0xff] %v1003_v54  ;;  %998 = vst [vmem:[#allocation2 + $0xe0] sm:$0xff] %v997_v55 }
  0xb4   :  { %v1251_v57 = vpack.c.bf16 %v1844_v27, %v1250_v53 }
  0xb5   :  { %v1563_v58 = vld [vmem:[#allocation3 + $0xa] sm:$0x3]  ;;  %v1561_v59 = vld [vmem:[#allocation3 + $0x8] sm:$0x3]  ;;  %1264 = vst [vmem:[#allocation3 + $0x12] sm:$0x3] %v1259_v56 }
  0xb6   :  { %1564 = vst [vmem:[%s2071_s1 + $0xa] sm:$0x3] %v1563_v58  ;;  %1562 = vst [vmem:[%s2071_s1 + $0x8] sm:$0x3] %v1561_v59  ;;  %v1274_v60 = vld [vmem:[#allocation2 + $0xf8] sm:$0xf]  ;;  %v1015_v62 = vpop.permute.xlu1 %1014  ;;  %v1009_v63 = vpop.permute.xlu0 %1008 }
  0xb7   :  { %1256 = vst [vmem:[#allocation3 + $0x10] sm:$0x3] %v1251_v57  ;;  %v1266_v61 = vld [vmem:[#allocation2 + $0xa8] sm:$0xf]  ;;  %v1275_v0 = vpack.c.bf16 %v1844_v27, %v1274_v60  ;;  %1016 = vst [vmem:[#allocation2 + $0xd8] sm:$0xff] %v1015_v62 }
  0xb8   :  { %v1267_v1 = vpack.c.bf16 %v1844_v27, %v1266_v61  ;;  %1010 = vst [vmem:[#allocation2 + $0xb8] sm:$0xff] %v1009_v63 }
  0xb9   :  { %v1567_v2 = vld [vmem:[#allocation3 + $0xe] sm:$0x3]  ;;  %v1565_v3 = vld [vmem:[#allocation3 + $0xc] sm:$0x3]  ;;  %1280 = vst [vmem:[#allocation3 + $0x16] sm:$0x3] %v1275_v0 }
  0xba   :  { %1568 = vst [vmem:[%s2071_s1 + $0xe] sm:$0x3] %v1567_v2  ;;  %1566 = vst [vmem:[%s2071_s1 + $0xc] sm:$0x3] %v1565_v3  ;;  %v1290_v4 = vld [vmem:[#allocation2 + $0xd0] sm:$0xf]  ;;  %v1027_v6 = vpop.permute.xlu1 %1026  ;;  %v1021_v7 = vpop.permute.xlu0 %1020 }
  0xbb   :  { %1272 = vst [vmem:[#allocation3 + $0x14] sm:$0x3] %v1267_v1  ;;  %v1282_v5 = vld [vmem:[#allocation2 + $0xe0] sm:$0xf]  ;;  %v1291_v8 = vpack.c.bf16 %v1844_v27, %v1290_v4  ;;  %1028 = vst [vmem:[#allocation2 + $0x138] sm:$0xff] %v1027_v6 }
  0xbc   :  { %v1283_v9 = vpack.c.bf16 %v1844_v27, %v1282_v5  ;;  %1022 = vst [vmem:[#allocation2 + $0x40] sm:$0xff] %v1021_v7  ;;  %v1571_v10 = vld [vmem:[#allocation3 + $0x12] sm:$0x3] }
  0xbd   :  { %1572 = vst [vmem:[%s2071_s1 + $0x12] sm:$0x3] %v1571_v10  ;;  %1296 = vst [vmem:[#allocation3 + $0x1a] sm:$0x3] %v1291_v8 }
  0xbe   :  { %v1569_v11 = vld [vmem:[#allocation3 + $0x10] sm:$0x3]  ;;  %1288 = vst [vmem:[#allocation3 + $0x18] sm:$0x3] %v1283_v9  ;;  %v1306_v12 = vld [vmem:[#allocation2 + $0xd8] sm:$0xf]  ;;  %v1039_v14 = vpop.permute.xlu1 %1038  ;;  %v1033_v15 = vpop.permute.xlu0 %1032 }
  0xbf   :  { %1570 = vst [vmem:[%s2071_s1 + $0x10] sm:$0x3] %v1569_v11  ;;  %v1298_v13 = vld [vmem:[#allocation2 + $0xb8] sm:$0xf]  ;;  %v1307_v16 = vpack.c.bf16 %v1844_v27, %v1306_v12  ;;  %1040 = vst [vmem:[#allocation2 + $0x148] sm:$0xff] %v1039_v14 }
  0xc0   :  { %v1299_v17 = vpack.c.bf16 %v1844_v27, %v1298_v13  ;;  %1034 = vst [vmem:[#allocation2 + $0x140] sm:$0xff] %v1033_v15  ;;  %v1575_v18 = vld [vmem:[#allocation3 + $0x16] sm:$0x3] }
  0xc1   :  { %1576 = vst [vmem:[%s2071_s1 + $0x16] sm:$0x3] %v1575_v18  ;;  %1312 = vst [vmem:[#allocation3 + $0x1e] sm:$0x3] %v1307_v16 }
  0xc2   :  { %v1573_v19 = vld [vmem:[#allocation3 + $0x14] sm:$0x3]  ;;  %1304 = vst [vmem:[#allocation3 + $0x1c] sm:$0x3] %v1299_v17  ;;  %v1322_v20 = vld [vmem:[#allocation2 + $0x138] sm:$0xf]  ;;  %v1051_v22 = vpop.permute.xlu1 %1050  ;;  %v1045_v23 = vpop.permute.xlu0 %1044 }
  0xc3   :  { %1574 = vst [vmem:[%s2071_s1 + $0x14] sm:$0x3] %v1573_v19  ;;  %v1314_v21 = vld [vmem:[#allocation2 + $0x40] sm:$0xf]  ;;  %v1323_v24 = vpack.c.bf16 %v1844_v27, %v1322_v20  ;;  %1052 = vst [vmem:[#allocation2 + $0x48] sm:$0xff] %v1051_v22 }
  0xc4   :  { %v1315_v25 = vpack.c.bf16 %v1844_v27, %v1314_v21  ;;  %1046 = vst [vmem:[#allocation2 + $0x98] sm:$0xff] %v1045_v23  ;;  %v1579_v26 = vld [vmem:[#allocation3 + $0x1a] sm:$0x3] }
  0xc5   :  { %v1577_v28 = vld [vmem:[#allocation3 + $0x18] sm:$0x3]  ;;  %1580 = vst [vmem:[%s2071_s1 + $0x1a] sm:$0x3] %v1579_v26  ;;  %1328 = vst [vmem:[#allocation3 + $0x22] sm:$0x3] %v1323_v24 }
  0xc6   :  { %1578 = vst [vmem:[%s2071_s1 + $0x18] sm:$0x3] %v1577_v28  ;;  %1320 = vst [vmem:[#allocation3 + $0x20] sm:$0x3] %v1315_v25  ;;  %v1338_v29 = vld [vmem:[#allocation2 + $0x148] sm:$0xf]  ;;  %v1063_v31 = vpop.permute.xlu1 %1062  ;;  %v1057_v32 = vpop.permute.xlu0 %1056 }
  0xc7   :  { %v1330_v30 = vld [vmem:[#allocation2 + $0x140] sm:$0xf]  ;;  %v1339_v33 = vpack.c.bf16 %v1844_v27, %v1338_v29  ;;  %1064 = vst [vmem:[#allocation2 + $0x158] sm:$0xff] %v1063_v31  ;;  %1058 = vst [vmem:[#allocation2 + $0x70] sm:$0xff] %v1057_v32 }
  0xc8   :  { %v1331_v34 = vpack.c.bf16 %v1844_v27, %v1330_v30  ;;  %v1583_v35 = vld [vmem:[#allocation3 + $0x1e] sm:$0x3] }
  0xc9   :  { %v1581_v36 = vld [vmem:[#allocation3 + $0x1c] sm:$0x3]  ;;  %1584 = vst [vmem:[%s2071_s1 + $0x1e] sm:$0x3] %v1583_v35  ;;  %1344 = vst [vmem:[#allocation3 + $0x26] sm:$0x3] %v1339_v33 }
  0xca   :  { %1582 = vst [vmem:[%s2071_s1 + $0x1c] sm:$0x3] %v1581_v36  ;;  %1336 = vst [vmem:[#allocation3 + $0x24] sm:$0x3] %v1331_v34  ;;  %v1354_v37 = vld [vmem:[#allocation2 + $0x48] sm:$0xf]  ;;  %v1075_v39 = vpop.permute.xlu1 %1074  ;;  %v1069_v40 = vpop.permute.xlu0 %1068 }
  0xcb   :  { %v1346_v38 = vld [vmem:[#allocation2 + $0x98] sm:$0xf]  ;;  %v1355_v41 = vpack.c.bf16 %v1844_v27, %v1354_v37  ;;  %1076 = vst [vmem:[#allocation2 + $0x60] sm:$0xff] %v1075_v39  ;;  %1070 = vst [vmem:[#allocation2 + $0xf0] sm:$0xff] %v1069_v40 }
  0xcc   :  { %v1347_v42 = vpack.c.bf16 %v1844_v27, %v1346_v38  ;;  %v1587_v43 = vld [vmem:[#allocation3 + $0x22] sm:$0x3] }
  0xcd   :  { %v1585_v44 = vld [vmem:[#allocation3 + $0x20] sm:$0x3]  ;;  %1588 = vst [vmem:[%s2071_s1 + $0x22] sm:$0x3] %v1587_v43  ;;  %1360 = vst [vmem:[#allocation3 + $0x2a] sm:$0x3] %v1355_v41 }
  0xce   :  { %1586 = vst [vmem:[%s2071_s1 + $0x20] sm:$0x3] %v1585_v44  ;;  %1352 = vst [vmem:[#allocation3 + $0x28] sm:$0x3] %v1347_v42  ;;  %v1370_v45 = vld [vmem:[#allocation2 + $0x158] sm:$0xf]  ;;  %v1087_v47 = vpop.permute.xlu1 %1086  ;;  %v1081_v48 = vpop.permute.xlu0 %1080 }
  0xcf   :  { %v1362_v46 = vld [vmem:[#allocation2 + $0x70] sm:$0xf]  ;;  %v1371_v49 = vpack.c.bf16 %v1844_v27, %v1370_v45  ;;  %1088 = vst [vmem:[#allocation2 + $0x68] sm:$0xff] %v1087_v47  ;;  %1082 = vst [vmem:[#allocation2 + $0x10] sm:$0xff] %v1081_v48 }
  0xd0   :  { %v1363_v50 = vpack.c.bf16 %v1844_v27, %v1362_v46  ;;  %v1591_v51 = vld [vmem:[#allocation3 + $0x26] sm:$0x3] }
  0xd1   :  { %v1589_v52 = vld [vmem:[#allocation3 + $0x24] sm:$0x3]  ;;  %1592 = vst [vmem:[%s2071_s1 + $0x26] sm:$0x3] %v1591_v51  ;;  %1376 = vst [vmem:[#allocation3 + $0x2e] sm:$0x3] %v1371_v49 }
  0xd2   :  { %1590 = vst [vmem:[%s2071_s1 + $0x24] sm:$0x3] %v1589_v52  ;;  %1368 = vst [vmem:[#allocation3 + $0x2c] sm:$0x3] %v1363_v50  ;;  %v1386_v53 = vld [vmem:[#allocation2 + $0x60] sm:$0xf]  ;;  %v1099_v55 = vpop.permute.xlu1 %1098  ;;  %v1093_v56 = vpop.permute.xlu0 %1092 }
  0xd3   :  { %v1378_v54 = vld [vmem:[#allocation2 + $0xf0] sm:$0xf]  ;;  %v1387_v57 = vpack.c.bf16 %v1844_v27, %v1386_v53  ;;  %1100 = vst [vmem:[#allocation2 + $0x100] sm:$0xff] %v1099_v55  ;;  %1094 = vst [vmem:[#allocation2 + $0x80] sm:$0xff] %v1093_v56 }
  0xd4   :  { %v1379_v58 = vpack.c.bf16 %v1844_v27, %v1378_v54  ;;  %v1595_v59 = vld [vmem:[#allocation3 + $0x2a] sm:$0x3] }
  0xd5   :  { %v1593_v60 = vld [vmem:[#allocation3 + $0x28] sm:$0x3]  ;;  %1596 = vst [vmem:[%s2071_s1 + $0x2a] sm:$0x3] %v1595_v59  ;;  %1392 = vst [vmem:[#allocation3 + $0x32] sm:$0x3] %v1387_v57 }
  0xd6   :  { %1594 = vst [vmem:[%s2071_s1 + $0x28] sm:$0x3] %v1593_v60  ;;  %1384 = vst [vmem:[#allocation3 + $0x30] sm:$0x3] %v1379_v58  ;;  %v1402_v61 = vld [vmem:[#allocation2 + $0x68] sm:$0xf]  ;;  %v1111_v63 = vpop.permute.xlu1 %1110  ;;  %v1105_v0 = vpop.permute.xlu0 %1104 }
  0xd7   :  { %v1394_v62 = vld [vmem:[#allocation2 + $0x10] sm:$0xf]  ;;  %v1403_v1 = vpack.c.bf16 %v1844_v27, %v1402_v61  ;;  %1112 = vst [vmem:[#allocation2 + $0xe8] sm:$0xff] %v1111_v63  ;;  %1106 = vst [vmem:[#allocation2 + $0x18] sm:$0xff] %v1105_v0 }
  0xd8   :  { %v1395_v2 = vpack.c.bf16 %v1844_v27, %v1394_v62  ;;  %v1599_v3 = vld [vmem:[#allocation3 + $0x2e] sm:$0x3] }
  0xd9   :  { %v1597_v4 = vld [vmem:[#allocation3 + $0x2c] sm:$0x3]  ;;  %1600 = vst [vmem:[%s2071_s1 + $0x2e] sm:$0x3] %v1599_v3  ;;  %1408 = vst [vmem:[#allocation3 + $0x36] sm:$0x3] %v1403_v1 }
  0xda   :  { %1598 = vst [vmem:[%s2071_s1 + $0x2c] sm:$0x3] %v1597_v4  ;;  %1400 = vst [vmem:[#allocation3 + $0x34] sm:$0x3] %v1395_v2  ;;  %v1418_v5 = vld [vmem:[#allocation2 + $0x100] sm:$0xf]  ;;  %v1123_v7 = vpop.permute.xlu1 %1122  ;;  %v1117_v8 = vpop.permute.xlu0 %1116 }
  0xdb   :  { %v1410_v6 = vld [vmem:[#allocation2 + $0x80] sm:$0xf]  ;;  %v1419_v9 = vpack.c.bf16 %v1844_v27, %v1418_v5  ;;  %1124 = vst [vmem:[#allocation2 + $0x20] sm:$0xff] %v1123_v7  ;;  %1118 = vst [vmem:[#allocation2 + $0x120] sm:$0xff] %v1117_v8 }
  0xdc   :  { %v1411_v10 = vpack.c.bf16 %v1844_v27, %v1410_v6  ;;  %v1603_v11 = vld [vmem:[#allocation3 + $0x32] sm:$0x3] }
  0xdd   :  { %v1601_v12 = vld [vmem:[#allocation3 + $0x30] sm:$0x3]  ;;  %1604 = vst [vmem:[%s2071_s1 + $0x32] sm:$0x3] %v1603_v11  ;;  %1424 = vst [vmem:[#allocation3 + $0x3a] sm:$0x3] %v1419_v9 }
  0xde   :  { %1602 = vst [vmem:[%s2071_s1 + $0x30] sm:$0x3] %v1601_v12  ;;  %1416 = vst [vmem:[#allocation3 + $0x38] sm:$0x3] %v1411_v10  ;;  %v1434_v13 = vld [vmem:[#allocation2 + $0xe8] sm:$0xf]  ;;  %v1135_v15 = vpop.permute.xlu1 %1134  ;;  %v1129_v16 = vpop.permute.xlu0 %1128 }
  0xdf   :  { %v1426_v14 = vld [vmem:[#allocation2 + $0x18] sm:$0xf]  ;;  %v1435_v17 = vpack.c.bf16 %v1844_v27, %v1434_v13  ;;  %1136 = vst [vmem:[#allocation2 + $0x8] sm:$0xff] %v1135_v15  ;;  %1130 = vst [vmem:[#allocation2 + $0x78] sm:$0xff] %v1129_v16 }
  0xe0   :  { %v1427_v18 = vpack.c.bf16 %v1844_v27, %v1426_v14  ;;  %v1607_v19 = vld [vmem:[#allocation3 + $0x36] sm:$0x3] }
  0xe1   :  { %v1605_v20 = vld [vmem:[#allocation3 + $0x34] sm:$0x3]  ;;  %1608 = vst [vmem:[%s2071_s1 + $0x36] sm:$0x3] %v1607_v19  ;;  %1440 = vst [vmem:[#allocation3 + $0x3e] sm:$0x3] %v1435_v17 }
  0xe2   :  { %1606 = vst [vmem:[%s2071_s1 + $0x34] sm:$0x3] %v1605_v20  ;;  %1432 = vst [vmem:[#allocation3 + $0x3c] sm:$0x3] %v1427_v18  ;;  %v1450_v21 = vld [vmem:[#allocation2 + $0x20] sm:$0xf]  ;;  %v1147_v23 = vpop.permute.xlu1 %1146  ;;  %v1141_v24 = vpop.permute.xlu0 %1140 }
  0xe3   :  { %v1442_v22 = vld [vmem:[#allocation2 + $0x120] sm:$0xf]  ;;  %v1451_v25 = vpack.c.bf16 %v1844_v27, %v1450_v21  ;;  %1148 = vst [vmem:[#allocation2 + $0x110] sm:$0xff] %v1147_v23  ;;  %1142 = vst [vmem:[#allocation2 + $0xa0] sm:$0xff] %v1141_v24 }
  0xe4   :  { %v1443_v26 = vpack.c.bf16 %v1844_v27, %v1442_v22  ;;  %v1611_v28 = vld [vmem:[#allocation3 + $0x3a] sm:$0x3] }
  0xe5   :  { %v1609_v29 = vld [vmem:[#allocation3 + $0x38] sm:$0x3]  ;;  %1612 = vst [vmem:[%s2071_s1 + $0x3a] sm:$0x3] %v1611_v28  ;;  %1456 = vst [vmem:[#allocation3 + $0x42] sm:$0x3] %v1451_v25 }
  0xe6   :  { %1610 = vst [vmem:[%s2071_s1 + $0x38] sm:$0x3] %v1609_v29  ;;  %1448 = vst [vmem:[#allocation3 + $0x40] sm:$0x3] %v1443_v26  ;;  %v1466_v30 = vld [vmem:[#allocation2 + $0x8] sm:$0xf]  ;;  %v1159_v32 = vpop.permute.xlu1 %1158  ;;  %v1153_v33 = vpop.permute.xlu0 %1152 }
  0xe7   :  { %v1458_v31 = vld [vmem:[#allocation2 + $0x78] sm:$0xf]  ;;  %v1467_v34 = vpack.c.bf16 %v1844_v27, %v1466_v30  ;;  %1160 = vst [vmem:[#allocation2 + $0x30] sm:$0xff] %v1159_v32  ;;  %1154 = vst [vmem:[#allocation2 + $0x50] sm:$0xff] %v1153_v33 }
  0xe8   :  { %v1459_v35 = vpack.c.bf16 %v1844_v27, %v1458_v31  ;;  %v1615_v36 = vld [vmem:[#allocation3 + $0x3e] sm:$0x3] }
  0xe9   :  { %v1613_v37 = vld [vmem:[#allocation3 + $0x3c] sm:$0x3]  ;;  %1616 = vst [vmem:[%s2071_s1 + $0x3e] sm:$0x3] %v1615_v36  ;;  %1472 = vst [vmem:[#allocation3 + $0x46] sm:$0x3] %v1467_v34 }
  0xea   :  { %1614 = vst [vmem:[%s2071_s1 + $0x3c] sm:$0x3] %v1613_v37  ;;  %1464 = vst [vmem:[#allocation3 + $0x44] sm:$0x3] %v1459_v35  ;;  %v1482_v38 = vld [vmem:[#allocation2 + $0x110] sm:$0xf]  ;;  %v1170_v40 = vpop.permute.xlu1 %1169  ;;  %v1164_v41 = vpop.permute.xlu0 %1163 }
  0xeb   :  { %v1474_v39 = vld [vmem:[#allocation2 + $0xa0] sm:$0xf]  ;;  %v1483_v42 = vpack.c.bf16 %v1844_v27, %v1482_v38  ;;  %1171 = vst [vmem:[#allocation2 + $0x58] sm:$0xff] %v1170_v40  ;;  %1165 = vst [vmem:[#allocation2 + $0x130] sm:$0xff] %v1164_v41 }
  0xec   :  { %v1475_v43 = vpack.c.bf16 %v1844_v27, %v1474_v39  ;;  %v1619_v44 = vld [vmem:[#allocation3 + $0x42] sm:$0x3] }
  0xed   :  { %v1617_v45 = vld [vmem:[#allocation3 + $0x40] sm:$0x3]  ;;  %1620 = vst [vmem:[%s2071_s1 + $0x42] sm:$0x3] %v1619_v44  ;;  %1488 = vst [vmem:[#allocation3 + $0x4a] sm:$0x3] %v1483_v42 }
  0xee   :  { %1618 = vst [vmem:[%s2071_s1 + $0x40] sm:$0x3] %v1617_v45  ;;  %1480 = vst [vmem:[#allocation3 + $0x48] sm:$0x3] %v1475_v43  ;;  %v1498_v46 = vld [vmem:[#allocation2 + $0x30] sm:$0xf]  ;;  %v1182_v48 = vpop.permute.xlu1 %1181  ;;  %v1176_v49 = vpop.permute.xlu0 %1175 }
  0xef   :  { %v1490_v47 = vld [vmem:[#allocation2 + $0x50] sm:$0xf]  ;;  %v1499_v50 = vpack.c.bf16 %v1844_v27, %v1498_v46  ;;  %1183 = vst [vmem:[#allocation2 + $0x128] sm:$0xff] %v1182_v48  ;;  %1177 = vst [vmem:[#allocation2 + $0x38] sm:$0xff] %v1176_v49 }
  0xf0   :  { %v1491_v51 = vpack.c.bf16 %v1844_v27, %v1490_v47  ;;  %v1623_v52 = vld [vmem:[#allocation3 + $0x46] sm:$0x3] }
  0xf1   :  { %v1621_v53 = vld [vmem:[#allocation3 + $0x44] sm:$0x3]  ;;  %1624 = vst [vmem:[%s2071_s1 + $0x46] sm:$0x3] %v1623_v52  ;;  %1504 = vst [vmem:[#allocation3 + $0x4e] sm:$0x3] %v1499_v50 }
  0xf2   :  { %1622 = vst [vmem:[%s2071_s1 + $0x44] sm:$0x3] %v1621_v53  ;;  %1496 = vst [vmem:[#allocation3 + $0x4c] sm:$0x3] %v1491_v51  ;;  %v1514_v54 = vld [vmem:[#allocation2 + $0x58] sm:$0xf] }
  0xf3   :  { %v1506_v55 = vld [vmem:[#allocation2 + $0x130] sm:$0xf]  ;;  %v1515_v56 = vpack.c.bf16 %v1844_v27, %v1514_v54 }
  0xf4   :  { %v1507_v57 = vpack.c.bf16 %v1844_v27, %v1506_v55  ;;  %v1627_v58 = vld [vmem:[#allocation3 + $0x4a] sm:$0x3] }
  0xf5   :  { %v1625_v59 = vld [vmem:[#allocation3 + $0x48] sm:$0x3]  ;;  %1628 = vst [vmem:[%s2071_s1 + $0x4a] sm:$0x3] %v1627_v58  ;;  %1520 = vst [vmem:[#allocation3 + $0x52] sm:$0x3] %v1515_v56 }
  0xf6   :  { %1626 = vst [vmem:[%s2071_s1 + $0x48] sm:$0x3] %v1625_v59  ;;  %1512 = vst [vmem:[#allocation3 + $0x50] sm:$0x3] %v1507_v57  ;;  %v1530_v60 = vld [vmem:[#allocation2 + $0x128] sm:$0xf] }
  0xf7   :  { %v1522_v61 = vld [vmem:[#allocation2 + $0x38] sm:$0xf]  ;;  %v1531_v62 = vpack.c.bf16 %v1844_v27, %v1530_v60 }
  0xf8   :  { %v1523_v27 = vpack.c.bf16 %v1844_v27, %v1522_v61  ;;  %v1631_v63 = vld [vmem:[#allocation3 + $0x4e] sm:$0x3] }
  0xf9   :  { %v1629_v0 = vld [vmem:[#allocation3 + $0x4c] sm:$0x3]  ;;  %1632 = vst [vmem:[%s2071_s1 + $0x4e] sm:$0x3] %v1631_v63  ;;  %1536 = vst [vmem:[#allocation3 + $0x56] sm:$0x3] %v1531_v62 }
  0xfa   :  { %1630 = vst [vmem:[%s2071_s1 + $0x4c] sm:$0x3] %v1629_v0  ;;  %1528 = vst [vmem:[#allocation3 + $0x54] sm:$0x3] %v1523_v27 }
  0xfc   :  { %v1635_v1 = vld [vmem:[#allocation3 + $0x52] sm:$0x3] }
  0xfd   :  { %v1633_v2 = vld [vmem:[#allocation3 + $0x50] sm:$0x3]  ;;  %1636 = vst [vmem:[%s2071_s1 + $0x52] sm:$0x3] %v1635_v1 }
  0xfe   :  { %1634 = vst [vmem:[%s2071_s1 + $0x50] sm:$0x3] %v1633_v2 }
 0x100   :  { %v1639_v3 = vld [vmem:[#allocation3 + $0x56] sm:$0x3] }
 0x101   :  { %v1637_v4 = vld [vmem:[#allocation3 + $0x54] sm:$0x3]  ;;  %1640 = vst [vmem:[%s2071_s1 + $0x56] sm:$0x3] %v1639_v3 }
 0x102   :  { %1638 = vst [vmem:[%s2071_s1 + $0x54] sm:$0x3] %v1637_v4 }

// kernel: _snet_forward_impl.20
= control target key start
LH: loop header
LB: loop body
LE: loop exit
PB: predicated region body
PF: predicated region fallthrough
CT: control target
= control target key end

     0   :  { %s525_s12 = smov 0   ;;  %s527_s13 = smov 0   ;;  %s568_s0 = inlined_call_operand.vmem [shape: bf16[32,8], index: 0, kind: input, shape index: {}]   ;;  %s569_s1 = inlined_call_operand.vmem [shape: bf16[8,128], index: 1, kind: input, shape index: {}]   ;;  %s570_s2 = inlined_call_operand.vmem [shape: f32[1,128], index: 2, kind: input, shape index: {}]   ;;  %s571_s3 = inlined_call_operand.vmem [shape: f32[32,128], index: 3, kind: output, shape index: {}]  }
   0x1   :  { %s529_s14 = smov 0  }
   0x2 LB: > { %s25_s15 = sadd.s32 1, %s497_s13  ;;  %p426_p0 = scmp.ge.s32.totalorder %s501_s14, 1  ;;  %s501_s14 = sphi %s529_s14, %s13_s14   ;;  %s497_s13 = sphi %s527_s13, %s573_s13   ;;  %s493_s12 = sphi %s525_s12, %s572_s12  }
   0x3   : > { %p27_p1 = scmp.ge.s32.totalorder %s25_s15, 2  ;;  %p169_p2 = scmp.lt.s32.totalorder %s501_s14, 3 }
   0x5   : > { %s575_s15 = smov (%p27_p1, %s25_s15), 0  ;;  %p170_p3 = pnand %p426_p0, %p169_p2 }
   0x6   : > { %s427_s18 = sshll.u32 (!%p170_p3), %s493_s12, 1 }
   0x7   : > { %173 = sbr.rel (%p170_p3) target bundleno = 258 (0x102), region = 32  ;;  %p204_p4 = scmp.lt.s32.totalorder (!%p170_p3), %s427_s18, 3 }
   0xc   : > { %v228_v0 = vld [vmem:[%s569_s1] sm:$0xf]  ;;  %vm245_vm0 = vcmask 1043456   ;;  %v503_v1 = vmov 0.0   ;;  %vm504_vm1 = vmmov 0   ;;  %s577_s18 = smov (!%p204_p4, %s427_s18), 3  ;;  %v309_v21 = vlaneseq }
   0xd   : > { %438 = vmatprep.subr.bf16.mxu0 %v503_v1  ;;  %v247_v2 = vsel %vm245_vm0, %v228_v0, 0  ;;  %440 = vmatprep.mubr.msk.bf16.mxu0 %vm504_vm1, %v503_v1  ;;  %s428_s19 = sshll.u32 %s577_s18, 2  ;;  %vm241_vm2 = vcmask 64512   ;;  %v431_v4 = vld [vmem:[%s570_s2] ss:$0 sm:$0xff]  ;;  %s430_s25 = sshll.u32 %s577_s18, 3 }
   0xe   : > { %439 = vmatpush3.bf16.msra.mxu0 %v247_v2  ;;  %s207_s22 = scalar_lea.vmem %s568_s0, %s428_s19  ;;  %v310_v22 = vand.u32 127, %v309_v21  ;;  %s223_s28 = scalar_lea.vmem %s571_s3, %s430_s25 }
   0xf   : > { %v470_v3 = vld [vmem:[%s207_s22] sm:$0xff]  }
  0x10   : > { %vm313_vm3 = vcmp.ge.s32.totalorder %v310_v22, 8 }
  0x11   : > { %441 = vmatmul.mubr.msk.bf16.vlgmr.msra.gmra.mxu0 %vm241_vm2, %v470_v3 }
  0xd1   : > { %v283_v5 = vpop.f32.mrf.mxu0 }
  0xd2   : > { %v284_v6 = vadd.f32 %v431_v4, %v283_v5 }
  0xd3   : > { %v442_v7 = vpop.f32.mrf.mxu0 }
  0xd4   : > { %v293_v8 = vand.u32 2147483647, %v284_v6  ;;  %v291_v24 = vmax.f32 %v284_v6, 0.0 }
  0xd5   : > { %v286_v9 = vpop.f32.mrf.mxu0 }
  0xd6   : > { %v295_v10 = vsub.f32 0.0, %v293_v8  ;;  %v287_v11 = vadd.f32 %v431_v4, %v286_v9 }
  0xd7   : > { %v443_v12 = vpop.f32.mrf.mxu0 }
  0xd8   : > { %v297_v13 = vmul.f32 1.442695, %v295_v10  ;;  %v294_v14 = vand.u32 2147483647, %v287_v11  ;;  %v292_v29 = vmax.f32 %v287_v11, 0.0 }
  0xda   : > { %471 = vpow2.f32 %v297_v13  ;;  %v296_v15 = vsub.f32 0.0, %v294_v14 }
  0xdc   : > { %v299_v16 = vmul.f32 1.442695, %v296_v15 }
  0xde   : > { %473 = vpow2.f32 %v299_v16 }
  0xe7   : > { %v472_v17 = vpop.eup %471 }
  0xe8   : > { %v301_v18 = vadd.f32 1.0, %v472_v17 }
  0xea   : > { %475 = vlog2.f32 %v301_v18 }
  0xeb   : > { %v474_v19 = vpop.eup %473 }
  0xec   : > { %v302_v20 = vadd.f32 1.0, %v474_v19 }
  0xee   : > { %477 = vlog2.f32 %v302_v20 }
  0xf7   : > { %v476_v23 = vpop.eup %475 }
  0xf8   : > { %v304_v25 = vmul.f32 0.6931472, %v476_v23 }
  0xfa   : > { %v307_v26 = vadd.f32 %v304_v25, %v291_v24 }
  0xfb   : > { %v478_v27 = vpop.eup %477 }
  0xfc   : > { %v314_v28 = vsel %vm313_vm3, %v307_v26, %v284_v6  ;;  %v306_v30 = vmul.f32 0.6931472, %v478_v27 }
  0xfd   : > { %316 = vst [vmem:[%s223_s28] sm:$0xff] %v314_v28 }
  0xfe   : > { %v308_v31 = vadd.f32 %v306_v30, %v292_v29 }
 0x100   : > { %v315_v32 = vsel %vm313_vm3, %v308_v31, %v287_v11 }
 0x101   : > { %317 = vst [vmem:[%s223_s28 + $0x8] sm:$0xff] %v315_v32 }
 0x102 PF: > { %s13_s14 = sadd.s32 1, %s501_s14   ;;  %s572_s12 = smov %s497_s13 }
 0x103   : > { %p10_p5 = scmp.ge.s32.totalorder %s13_s14, 4   ;;  %s573_s13 = smov %s575_s15 }
 0x105   :  { %12 = sbr.rel (!%p10_p5) target bundleno = 2 (0x2), region = 68 }

// kernel: _snet_forward_impl.23
= control target key start
LH: loop header
LB: loop body
LE: loop exit
PB: predicated region body
PF: predicated region fallthrough
CT: control target
= control target key end

     0   :  { %s658_s18 = smov 0   ;;  %s712_s0 = inlined_call_operand.vmem [shape: bf16[64,16], index: 0, kind: input, shape index: {}]   ;;  %s713_s1 = inlined_call_operand.vmem [shape: bf16[16,128], index: 1, kind: input, shape index: {}]   ;;  %s714_s2 = inlined_call_operand.vmem [shape: f32[1,128], index: 2, kind: input, shape index: {}]   ;;  %s715_s3 = inlined_call_operand.vmem [shape: bf16[128,128], index: 3, kind: input, shape index: {}]   ;;  %s716_s4 = inlined_call_operand.vmem [shape: f32[1,128], index: 4, kind: input, shape index: {}]   ;;  %s717_s5 = inlined_call_operand.vmem [shape: f32[64,128], index: 5, kind: output, shape index: {}]  }
   0x1 LB: > { %s520_s19 = sadd.s32 4294967295, %s626_s18   ;;  %p524_p0 = scmp.ge.s32.totalorder %s626_s18, 1  ;;  %s626_s18 = sphi %s658_s18, %s15_s18  }
   0x2   : > { %p188_p1 = scmp.lt.s32.totalorder %s626_s18, 3 }
   0x4   : > { %p189_p2 = pnand %p524_p0, %p188_p1 }
   0x5   : > { %s525_s22 = sshll.u32 (!%p189_p2), %s520_s19, 2 }
   0x6   : > { %192 = sbr.rel (%p189_p2) target bundleno = 460 (0x1cc), region = 40  ;;  %p217_p3 = scmp.lt.s32.totalorder (!%p189_p2), %s525_s22, 7 }
   0xb   : > { %v593_v0 = vld [vmem:[%s713_s1] sm:$0xff]   ;;  %v596_v1 = vld [vmem:[%s715_s3 + $0x38] sm:$0xff]   ;;  %s719_s22 = smov (!%p217_p3, %s525_s22), 7  ;;  %v597_v2 = vld [vmem:[%s715_s3 + $0x30] sm:$0xff]   ;;  %vm258_vm0 = vcmask 130048  }
   0xc   : > { %559 = vmatprep.subr.bf16.mxu0 %v593_v0  ;;  %565 = vmatprep.subr.bf16.mxu1 %v596_v1  ;;  %s526_s27 = sshll.u32 %s719_s22, 2  ;;  %v598_v3 = vld [vmem:[%s715_s3 + $0x28] sm:$0xff]   ;;  %v599_v6 = vld [vmem:[%s715_s3 + $0x20] sm:$0xff]   ;;  %v600_v7 = vld [vmem:[%s715_s3 + $0x18] sm:$0xff]   ;;  %s528_s24 = sshll.u32 %s719_s22, 3 }
   0xd   : > { %560 = vmatpush3.bf16.msra.mxu0 %v593_v0  ;;  %566 = vmatpush3.bf16.msra.mxu1 %v596_v1  ;;  %s220_s7 = scalar_lea.vmem %s712_s0, %s526_s27  ;;  %v601_v8 = vld [vmem:[%s715_s3 + $0x10] sm:$0xff]   ;;  %v602_v9 = vld [vmem:[%s715_s3 + $0x8] sm:$0xff]   ;;  %v603_v10 = vld [vmem:[%s715_s3] sm:$0xff]   ;;  %s226_s27 = scalar_lea.vmem %s717_s5, %s528_s24 }
   0xe   : > { %567 = vmatprep.subr.bf16.mxu1 %v597_v2  ;;  %v594_v4 = vld [vmem:[%s220_s7] sm:$0xff]   ;;  %v595_v5 = vld [vmem:[%s220_s7 + $0x8] sm:$0xff]  }
   0xf   : > { %561 = vmatprep.mubr.msk.bf16.mxu0 %vm258_vm0, %v594_v4  ;;  %v529_v13 = vld [vmem:[%s714_s2] ss:$0 sm:$0xff] }
  0x10   : > { %562 = vmatmul.mubr.msk.bf16.vlgmr.msra.gmra.mxu0 %vm258_vm0, %v595_v5  ;;  %v535_v26 = vld [vmem:[%s716_s4] ss:$0 sm:$0xff] }
  0x11   : > { %568 = vmatpush3.bf16.msra.mxu1 %v597_v2 }
  0x12   : > { %569 = vmatprep.subr.bf16.mxu1 %v598_v3 }
  0x15   : > { %570 = vmatpush3.bf16.msra.mxu1 %v598_v3 }
  0x16   : > { %571 = vmatprep.subr.bf16.mxu1 %v599_v6 }
  0x19   : > { %572 = vmatpush3.bf16.msra.mxu1 %v599_v6 }
  0x1a   : > { %573 = vmatprep.subr.bf16.mxu1 %v600_v7 }
  0x1d   : > { %574 = vmatpush3.bf16.msra.mxu1 %v600_v7 }
  0x1e   : > { %575 = vmatprep.subr.bf16.mxu1 %v601_v8 }
  0x21   : > { %576 = vmatpush3.bf16.msra.mxu1 %v601_v8 }
  0x22   : > { %577 = vmatprep.subr.bf16.mxu1 %v602_v9 }
  0x25   : > { %578 = vmatpush3.bf16.msra.mxu1 %v602_v9 }
  0x26   : > { %579 = vmatprep.subr.bf16.mxu1 %v603_v10 }
  0x29   : > { %580 = vmatpush3.bf16.msra.mxu1 %v603_v10 }
  0xd0   : > { %v563_v11 = vpop.f32.mrf.mxu0 }
  0xd1   : > { %v308_v17 = vadd.f32 %v563_v11, %v529_v13 }
  0xd2   : > { %v299_v12 = vpop.f32.mrf.mxu0 }
  0xd3   : > { %v300_v15 = vadd.f32 %v529_v13, %v299_v12  ;;  %v316_v23 = vmax.f32 %v308_v17, 0.0 }
  0xd4   : > { %v564_v14 = vpop.f32.mrf.mxu0 }
  0xd5   : > { %v311_v16 = vadd.f32 %v564_v14, %v529_v13  ;;  %v314_v21 = vmax.f32 %v300_v15, 0.0 }
  0xd6   : > { %v302_v18 = vpop.f32.mrf.mxu0 }
  0xd7   : > { %v303_v19 = vadd.f32 %v529_v13, %v302_v18  ;;  %v317_v20 = vmax.f32 %v311_v16, 0.0 }
  0xd9   : > { %v315_v22 = vmax.f32 %v303_v19, 0.0  ;;  %v319_v25 = vpack.c.bf16 %v317_v20, %v316_v23 }
  0xdb   : > { %v318_v24 = vpack.c.bf16 %v315_v22, %v314_v21 }
  0xdd   : > { %581 = vmatprep.mubr.bf16.mxu1 %v318_v24 }
  0xde   : > { %582 = vmatmul.mubr.bf16.vlgmr.msra.gmra.mxu1 %v319_v25 }
 0x19e   : > { %v583_v27 = vpop.f32.mrf.mxu1 }
 0x19f   : > { %v434_v28 = vadd.f32 %v583_v27, %v535_v26 }
 0x1a0   : > { %v425_v29 = vpop.f32.mrf.mxu1 }
 0x1a1   : > { %v442_v30 = vsub.f32 0.0, %v434_v28  ;;  %v426_v31 = vadd.f32 %v535_v26, %v425_v29 }
 0x1a2   : > { %v584_v32 = vpop.f32.mrf.mxu1 }
 0x1a3   : > { %v440_v33 = vsub.f32 0.0, %v426_v31  ;;  %v437_v34 = vadd.f32 %v584_v32, %v535_v26  ;;  %v448_v35 = vmul.f32 1.442695, %v442_v30 }
 0x1a4   : > { %v428_v36 = vpop.f32.mrf.mxu1 }
 0x1a5   : > { %v444_v37 = vmul.f32 1.442695, %v440_v33  ;;  %v443_v38 = vsub.f32 0.0, %v437_v34  ;;  %v429_v39 = vadd.f32 %v535_v26, %v428_v36 }
 0x1a7   : > { %604 = vpow2.f32 %v444_v37  ;;  %v450_v40 = vmul.f32 1.442695, %v443_v38  ;;  %v441_v41 = vsub.f32 0.0, %v429_v39 }
 0x1a8   : > { %606 = vpow2.f32 %v448_v35 }
 0x1a9   : > { %608 = vpow2.f32 %v450_v40  ;;  %v446_v42 = vmul.f32 1.442695, %v441_v41 }
 0x1ab   : > { %610 = vpow2.f32 %v446_v42 }
 0x1b4   : > { %v605_v43 = vpop.eup %604 }
 0x1b5   : > { %v607_v44 = vpop.eup %606  ;;  %v452_v45 = vadd.f32 1.0, %v605_v43 }
 0x1b6   : > { %v609_v46 = vpop.eup %608  ;;  %v454_v48 = vadd.f32 1.0, %v607_v44 }
 0x1b7   : > { %612 = vrcp.f32 %v452_v45  ;;  %v455_v49 = vadd.f32 1.0, %v609_v46 }
 0x1b8   : > { %v611_v47 = vpop.eup %610 }
 0x1b9   : > { %v453_v50 = vadd.f32 1.0, %v611_v47 }
 0x1bb   : > { %614 = vrcp.f32 %v453_v50 }
 0x1bc   : > { %616 = vrcp.f32 %v454_v48 }
 0x1bd   : > { %618 = vrcp.f32 %v455_v49 }
 0x1c4   : > { %v613_v51 = vpop.eup %612 }
 0x1c5   : > { %460 = vst [vmem:[%s226_s27] sm:$0xff] %v613_v51 }
 0x1c8   : > { %v615_v52 = vpop.eup %614 }
 0x1c9   : > { %v617_v53 = vpop.eup %616  ;;  %461 = vst [vmem:[%s226_s27 + $0x8] sm:$0xff] %v615_v52 }
 0x1ca   : > { %v619_v54 = vpop.eup %618  ;;  %462 = vst [vmem:[%s226_s27 + $0x10] sm:$0xff] %v617_v53 }
 0x1cb   : > { %463 = vst [vmem:[%s226_s27 + $0x18] sm:$0xff] %v619_v54 }
 0x1cc PF: > { %s15_s18 = sadd.s32 1, %s626_s18  }
 0x1cd   : > { %p12_p4 = scmp.ge.s32.totalorder %s15_s18, 4  }
 0x1cf   :  { %14 = sbr.rel (!%p12_p4) target bundleno = 1 (0x1), region = 70 }

// kernel: _snet_forward_impl.22
= control target key start
LH: loop header
LB: loop body
LE: loop exit
PB: predicated region body
PF: predicated region fallthrough
CT: control target
= control target key end

     0   :  { %s491_s12 = smov 0   ;;  %s493_s13 = smov 0   ;;  %s530_s0 = inlined_call_operand.vmem [shape: bf16[32,8], index: 0, kind: input, shape index: {}]   ;;  %s531_s1 = inlined_call_operand.vmem [shape: bf16[8,128], index: 1, kind: input, shape index: {}]   ;;  %s532_s2 = inlined_call_operand.vmem [shape: f32[1,128], index: 2, kind: input, shape index: {}]   ;;  %s533_s3 = inlined_call_operand.vmem [shape: f32[32,128], index: 3, kind: output, shape index: {}]  }
   0x1   :  { %s495_s14 = smov 0  }
   0x2 LB: > { %s25_s15 = sadd.s32 1, %s463_s13  ;;  %p400_p0 = scmp.ge.s32.totalorder %s467_s14, 1  ;;  %s467_s14 = sphi %s495_s14, %s13_s14   ;;  %s463_s13 = sphi %s493_s13, %s535_s13   ;;  %s459_s12 = sphi %s491_s12, %s534_s12  }
   0x3   : > { %p27_p1 = scmp.ge.s32.totalorder %s25_s15, 2  ;;  %p169_p2 = scmp.lt.s32.totalorder %s467_s14, 3 }
   0x5   : > { %s537_s15 = smov (%p27_p1, %s25_s15), 0  ;;  %p170_p3 = pnand %p400_p0, %p169_p2 }
   0x6   : > { %s401_s18 = sshll.u32 (!%p170_p3), %s459_s12, 1 }
   0x7   : > { %173 = sbr.rel (%p170_p3) target bundleno = 217 (0xd9), region = 32  ;;  %p204_p4 = scmp.lt.s32.totalorder (!%p170_p3), %s401_s18, 3 }
   0xc   : > { %v228_v0 = vld [vmem:[%s531_s1] sm:$0xf]  ;;  %vm245_vm0 = vcmask 1043456   ;;  %v469_v1 = vmov 0.0   ;;  %vm470_vm1 = vmmov 0   ;;  %s539_s18 = smov (!%p204_p4, %s401_s18), 3 }
   0xd   : > { %412 = vmatprep.subr.bf16.mxu0 %v469_v1  ;;  %v247_v2 = vsel %vm245_vm0, %v228_v0, 0  ;;  %414 = vmatprep.mubr.msk.bf16.mxu0 %vm470_vm1, %v469_v1  ;;  %s402_s19 = sshll.u32 %s539_s18, 2  ;;  %vm241_vm2 = vcmask 64512   ;;  %s404_s23 = sshll.u32 %s539_s18, 3  ;;  %v405_v4 = vld [vmem:[%s532_s2] ss:$0 sm:$0xff] }
   0xe   : > { %413 = vmatpush3.bf16.msra.mxu0 %v247_v2  ;;  %s207_s22 = scalar_lea.vmem %s530_s0, %s402_s19  ;;  %s223_s28 = scalar_lea.vmem %s533_s3, %s404_s23 }
   0xf   : > { %v444_v3 = vld [vmem:[%s207_s22] sm:$0xff]  }
  0x11   : > { %415 = vmatmul.mubr.msk.bf16.vlgmr.msra.gmra.mxu0 %vm241_vm2, %v444_v3 }
  0xd1   : > { %v283_v5 = vpop.f32.mrf.mxu0 }
  0xd2   : > { %v284_v6 = vadd.f32 %v405_v4, %v283_v5 }
  0xd3   : > { %v416_v7 = vpop.f32.mrf.mxu0 }
  0xd4   : > { %290 = vst [vmem:[%s223_s28] sm:$0xff] %v284_v6 }
  0xd5   : > { %v286_v8 = vpop.f32.mrf.mxu0 }
  0xd6   : > { %v287_v9 = vadd.f32 %v405_v4, %v286_v8 }
  0xd7   : > { %v417_v10 = vpop.f32.mrf.mxu0 }
  0xd8   : > { %291 = vst [vmem:[%s223_s28 + $0x8] sm:$0xff] %v287_v9 }
  0xd9 PF: > { %s13_s14 = sadd.s32 1, %s467_s14   ;;  %s534_s12 = smov %s463_s13 }
  0xda   : > { %p10_p5 = scmp.ge.s32.totalorder %s13_s14, 4   ;;  %s535_s13 = smov %s537_s15 }
  0xdc   :  { %12 = sbr.rel (!%p10_p5) target bundleno = 2 (0x2), region = 68 }

// kernel: reverse.11
= control target key start
LH: loop header
LB: loop body
LE: loop exit
PB: predicated region body
PF: predicated region fallthrough
CT: control target
= control target key end

     0   :  { %v2_v0 = vlaneseq  ;;  %s99_s0 = inlined_call_operand.vmem [shape: f32[8,15], index: 0, kind: input, shape index: {}]   ;;  %s100_s1 = inlined_call_operand.vmem [shape: f32[8,15], index: 1, kind: output, shape index: {}]  }
   0x1   :  { %v33_v2 = vld [vmem:[%s99_s0] sm:$0xff] }
   0x2   :  { %v3_v1 = vsub.s32 14, %v2_v0 }
   0x4   :  { %4 = vset.pattern.permute.xlu0 %v3_v1 }
   0x5   :  { %39 = vperm.xlu0 %4, %v33_v2  }
  0x80   :  { %v40_v3 = vpop.permute.xlu0 %39 }
  0x81   :  { %71 = vst [vmem:[%s100_s1] sm:$0xff] %v40_v3 }

// kernel: reverse.3
= control target key start
LH: loop header
LB: loop body
LE: loop exit
PB: predicated region body
PF: predicated region fallthrough
CT: control target
= control target key end

     0   :  { %v2_v0 = vlaneseq  ;;  %s119_s0 = inlined_call_operand.vmem [shape: f32[2,8,11], index: 0, kind: input, shape index: {}]   ;;  %s120_s1 = inlined_call_operand.vmem [shape: f32[2,8,11], index: 1, kind: output, shape index: {}]  }
   0x1   :  { %v35_v2 = vld [vmem:[%s119_s0] sm:$0xff]  ;;  %v37_v3 = vld [vmem:[%s119_s0 + $0x8] sm:$0xff] }
   0x2   :  { %v3_v1 = vsub.s32 10, %v2_v0 }
   0x4   :  { %4 = vset.pattern.permute.xlu0 %v3_v1 }
   0x5   :  { %43 = vperm.xlu0 %4, %v35_v2  }
   0x9   :  { %49 = vperm.xlu0 %4, %v37_v3  }
  0x80   :  { %v44_v4 = vpop.permute.xlu0 %43 }
  0x81   :  { %83 = vst [vmem:[%s120_s1] sm:$0xff] %v44_v4 }
  0x84   :  { %v50_v5 = vpop.permute.xlu0 %49 }
  0x85   :  { %85 = vst [vmem:[%s120_s1 + $0x8] sm:$0xff] %v50_v5 }

// kernel: _snet_forward_impl.21
= control target key start
LH: loop header
LB: loop body
LE: loop exit
PB: predicated region body
PF: predicated region fallthrough
CT: control target
= control target key end

     0   :  { %s468_s12 = smov 0   ;;  %s470_s13 = smov 0   ;;  %s507_s0 = inlined_call_operand.vmem [shape: bf16[16,8], index: 0, kind: input, shape index: {}]   ;;  %s508_s1 = inlined_call_operand.vmem [shape: bf16[8,128], index: 1, kind: input, shape index: {}]   ;;  %s509_s2 = inlined_call_operand.vmem [shape: f32[1,128], index: 2, kind: input, shape index: {}]   ;;  %s510_s3 = inlined_call_operand.vmem [shape: f32[16,128], index: 3, kind: output, shape index: {}]  }
   0x1   :  { %s472_s14 = smov 0  }
   0x2 LB: > { %s25_s15 = sadd.s32 1, %s440_s13  ;;  %p381_p0 = scmp.ge.s32.totalorder %s444_s14, 1  ;;  %s444_s14 = sphi %s472_s14, %s13_s14   ;;  %s440_s13 = sphi %s470_s13, %s512_s13   ;;  %s436_s12 = sphi %s468_s12, %s511_s12  }
   0x3   : > { %p27_p1 = scmp.ge.s32.totalorder %s25_s15, 2  ;;  %p167_p2 = scmp.lt.s32.totalorder %s444_s14, 3 }
   0x5   : > { %s514_s15 = smov (%p27_p1, %s25_s15), 0  ;;  %p168_p3 = pnand %p381_p0, %p167_p2 }
   0x6   : > { %p199_p4 = scmp.lt.s32.totalorder (!%p168_p3), %s436_s12, 1 }
   0x7   : > { %171 = sbr.rel (%p168_p3) target bundleno = 216 (0xd8), region = 32 }
   0xc   : > { %v219_v0 = vld [vmem:[%s508_s1] sm:$0xf]  ;;  %vm231_vm0 = vcmask 1043456   ;;  %v446_v1 = vmov 0.0   ;;  %vm447_vm1 = vmmov 0   ;;  %s516_s12 = smov (!%p199_p4, %s436_s12), 1 }
   0xd   : > { %390 = vmatprep.subr.bf16.mxu0 %v446_v1  ;;  %v233_v2 = vsel %vm231_vm0, %v219_v0, 0  ;;  %392 = vmatprep.mubr.msk.bf16.mxu0 %vm447_vm1, %v446_v1  ;;  %s382_s18 = sshll.u32 %s516_s12, 2  ;;  %vm227_vm2 = vcmask 64512   ;;  %s383_s22 = sshll.u32 %s516_s12, 3  ;;  %v384_v4 = vld [vmem:[%s509_s2] ss:$0 sm:$0xff] }
   0xe   : > { %391 = vmatpush3.bf16.msra.mxu0 %v233_v2  ;;  %s202_s21 = scalar_lea.vmem %s507_s0, %s382_s18  ;;  %s216_s27 = scalar_lea.vmem %s510_s3, %s383_s22 }
   0xf   : > { %v218_v3 = vld [vmem:[%s202_s21] sm:$0xf] }
  0x11   : > { %393 = vmatmul.mubr.msk.bf16.vlgmr.msra.gmra.mxu0 %vm227_vm2, %v218_v3 }
  0xd1   : > { %v269_v5 = vpop.f32.mrf.mxu0 }
  0xd2   : > { %v270_v6 = vadd.f32 %v384_v4, %v269_v5 }
  0xd3   : > { %v394_v7 = vpop.f32.mrf.mxu0 }
  0xd4   : > { %275 = vst [vmem:[%s216_s27] sm:$0xff] %v270_v6 }
  0xd5   : > { %v272_v8 = vpop.f32.mrf.mxu0 }
  0xd7   : > { %v395_v9 = vpop.f32.mrf.mxu0 }
  0xd8 PF: > { %s13_s14 = sadd.s32 1, %s444_s14   ;;  %s511_s12 = smov %s440_s13 }
  0xd9   : > { %p10_p5 = scmp.ge.s32.totalorder %s13_s14, 4   ;;  %s512_s13 = smov %s514_s15 }
  0xdb   :  { %12 = sbr.rel (!%p10_p5) target bundleno = 2 (0x2), region = 68 }

</bundles_post_ra>
